<compile_context>
chip_gen: v7x
topology: tpu7x:2x2x1
jax: 0.10.0
libtpu: 0.0.40
codegen_flags: <defaults>
</compile_context>

<pallas_src>
import jax
import jax.numpy as jnp
import numpy as np
from jax.experimental import pallas as pl
from jax.experimental.pallas import tpu as pltpu


# --------------------------------------------------------------------------- #
# Parameter-side glue (pure JAX): shift matrix, Cayley transform
# --------------------------------------------------------------------------- #
def _fft_shift_matrix(n, s):
    idx = jnp.arange(n)
    shift = idx[None, :] + idx[:, None]                     # shift[i,j] = i + j
    return jnp.exp(1j * 2.0 * np.pi * s * shift / n)        # (n, n) complex64


def _H(m):
    """Conjugate transpose of the last two axes of a batched matrix."""
    return jnp.conj(jnp.swapaxes(m, -1, -2))


def _cinv(z):
    """Batched complex matrix inverse via the real 2c x 2c block form
    (avoids complex64 linalg on TPU)."""
    zr, zi = jnp.real(z), jnp.imag(z)
    top = jnp.concatenate([zr, -zi], axis=-1)
    bot = jnp.concatenate([zi, zr], axis=-1)
    m = jnp.concatenate([top, bot], axis=-2)                 # (F, 2c, 2c) f32
    minv = jnp.linalg.inv(m)
    c = z.shape[-1]
    return minv[..., :c, :c] + 1j * minv[..., c:, :c]


def _cayley(w):
    """Batched Cayley transform, mirrors the PyTorch cayley()."""
    _, rows, cols = w.shape
    if cols > rows:
        return jnp.swapaxes(_cayley(jnp.swapaxes(w, 1, 2)), 1, 2)
    u = w[:, :cols, :]
    v = w[:, cols:, :]
    eye = jnp.eye(cols, dtype=w.dtype)[None]
    with jax.default_matmul_precision("highest"):
        a = u - _H(u) + _H(v) @ v
        i_ipa = _cinv(eye + a)
        return jnp.concatenate([i_ipa @ (eye - a), -2.0 * v @ i_ipa], axis=1)


# --------------------------------------------------------------------------- #
# Pallas kernel: per-frequency complex channel mixing  y = 2 * Q1^H Q2 x
# --------------------------------------------------------------------------- #
def _freq_mix(qr, qi, xr, xi):
    """qr/qi: (cout, chn, F) f32 real/imag of Q (frequency minor).
       xr/xi: (B, cin, F)   f32 real/imag of rfft2(x) (frequency minor).
       returns yr, yi: (B, cout, F) f32 with  y[b,:,f] = 2 * Q1[f]^H Q2[f] x[b,:,f].
    """
    cout, chn, f_total = qr.shape
    cin = chn - cout
    batch = xr.shape[0]

    # Lane-block along the frequency axis; pad F up to a multiple of the block.
    fblk = 512 if f_total >= 4096 else 128
    nf = -(-f_total // fblk)
    fp = nf * fblk
    pad = fp - f_total
    if pad:
        qr = jnp.pad(qr, ((0, 0), (0, 0), (0, pad)))
        qi = jnp.pad(qi, ((0, 0), (0, 0), (0, pad)))
        xr = jnp.pad(xr, ((0, 0), (0, 0), (0, pad)))
        xi = jnp.pad(xi, ((0, 0), (0, 0), (0, pad)))

    def kernel(qr_ref, qi_ref, xr_ref, xi_ref, yr_ref, yi_ref, mr_ref, mi_ref):
        # qr/qi: (cout, chn, fblk); xr/xi: (1, cin, fblk); yr/yi: (1, cout, fblk)
        # mr/mi: VMEM scratch (cout, cin, fblk) holding M = 2 * Q1^H Q2 for this
        # frequency block; parameter-only, so compute it once (first batch step)
        # and reuse it for every batch element.
        @pl.when(pl.program_id(1) == 0)
        def _compute_m():
            for co in range(cout):
                acc_r = jnp.zeros((cin, fblk), jnp.float32)
                acc_i = jnp.zeros((cin, fblk), jnp.float32)
                for kk in range(cout):
                    q1r = qr_ref[kk, co:co + 1, :]          # (1, fblk)
                    q1i = qi_ref[kk, co:co + 1, :]
                    q2r = qr_ref[kk, cout:, :]              # (cin, fblk)
                    q2i = qi_ref[kk, cout:, :]
                    # conj(Q1) * Q2 = (ac + bd) + i (ad - bc)
                    acc_r = acc_r + q1r * q2r + q1i * q2i
                    acc_i = acc_i + q1r * q2i - q1i * q2r
                mr_ref[co] = 2.0 * acc_r
                mi_ref[co] = 2.0 * acc_i

        x_r = xr_ref[0]                                     # (cin, fblk)
        x_i = xi_ref[0]
        yr_rows = []
        yi_rows = []
        for co in range(cout):
            m_r = mr_ref[co]                                # (cin, fblk)
            m_i = mi_ref[co]
            yr_rows.append(jnp.sum(m_r * x_r - m_i * x_i, axis=0, keepdims=True))
            yi_rows.append(jnp.sum(m_r * x_i + m_i * x_r, axis=0, keepdims=True))
        # single lane-dense store of the whole output block
        yr_ref[0] = jnp.concatenate(yr_rows, axis=0)
        yi_ref[0] = jnp.concatenate(yi_rows, axis=0)

    flops = int(8 * fp * cout * cin * (cout + batch))
    bytes_accessed = int(4 * fp * (2 * cout * chn + 2 * batch * (cin + cout)))

    yr, yi = pl.pallas_call(
        kernel,
        out_shape=(jax.ShapeDtypeStruct((batch, cout, fp), jnp.float32),
                   jax.ShapeDtypeStruct((batch, cout, fp), jnp.float32)),
        grid_spec=pltpu.PrefetchScalarGridSpec(
            num_scalar_prefetch=0,
            grid=(nf, batch),
            in_specs=[
                pl.BlockSpec((cout, chn, fblk), lambda fb, b: (0, 0, fb)),
                pl.BlockSpec((cout, chn, fblk), lambda fb, b: (0, 0, fb)),
                pl.BlockSpec((1, cin, fblk), lambda fb, b: (b, 0, fb)),
                pl.BlockSpec((1, cin, fblk), lambda fb, b: (b, 0, fb)),
            ],
            out_specs=[
                pl.BlockSpec((1, cout, fblk), lambda fb, b: (b, 0, fb)),
                pl.BlockSpec((1, cout, fblk), lambda fb, b: (b, 0, fb)),
            ],
            scratch_shapes=[pltpu.VMEM((cout, cin, fblk), jnp.float32),
                            pltpu.VMEM((cout, cin, fblk), jnp.float32)]),
        compiler_params=pltpu.CompilerParams(
            dimension_semantics=("parallel", "arbitrary"),
            vmem_limit_bytes=32 * 1024 * 1024),
        cost_estimate=pl.CostEstimate(flops=flops, transcendentals=0,
                                      bytes_accessed=bytes_accessed),
    )(qr, qi, xr, xi)
    return yr[:, :, :f_total], yi[:, :, :f_total]


# --------------------------------------------------------------------------- #
# Full forward (Pallas-backed)
# --------------------------------------------------------------------------- #
def sandwich_conv_lin(x, weight, bias, alpha=None, scale=1.0):
    """x: (B, cin, n, n); weight: (cout, cin+cout, k, k); bias: (cout,) or None."""
    batch, cin, n, _ = x.shape
    cout, chn, k, _ = weight.shape
    assert chn - cout == cin
    nh = n // 2 + 1
    f_total = n * nh
    s = (k - 1) // 2

    # ---- parameter-only glue (XLA): wfft, Cayley orthogonalization -----------
    shift = _fft_shift_matrix(n, -s)[:, :nh].reshape(f_total, 1, 1)
    wfft = jnp.fft.rfft2(weight, s=(n, n), axes=(-2, -1))
    wfft = shift * wfft.reshape(cout, chn, f_total).transpose(2, 0, 1).conj()
    wnorm = jnp.sqrt(jnp.sum(jnp.abs(wfft) ** 2))
    if alpha is None:                      # matches the module's first-forward init
        alpha = wnorm
    qfft = _cayley(alpha * wfft / wnorm)                     # (F, cout, chn)

    # ---- data path ------------------------------------------------------------
    xfft = jnp.fft.rfft2(scale * x, axes=(-2, -1)).reshape(batch, cin, f_total)

    q_t = jnp.transpose(qfft, (1, 2, 0))                     # (cout, chn, F), F minor
    yr, yi = _freq_mix(jnp.real(q_t).astype(jnp.float32),
                       jnp.imag(q_t).astype(jnp.float32),
                       jnp.real(xfft).astype(jnp.float32),
                       jnp.imag(xfft).astype(jnp.float32))

    yfft = (yr + 1j * yi).reshape(batch, cout, n, nh)
    y = jnp.fft.irfft2(yfft, s=(n, n), axes=(-2, -1))
    if bias is not None:
        y = y + bias[None, :, None, None]
    return y


# --------------------------------------------------------------------------- #
# Pure-JAX reference that mirrors the PyTorch forward op-for-op
# --------------------------------------------------------------------------- #
def sandwich_conv_lin_reference(x, weight, bias, alpha=None, scale=1.0):
    batch, cin, n, _ = x.shape
    cout, chn, k, _ = weight.shape
    nh = n // 2 + 1
    f_total = n * nh
    s = (k - 1) // 2

    shift = _fft_shift_matrix(n, -s)[:, :nh].reshape(f_total, 1, 1)
    wfft = jnp.fft.rfft2(weight, s=(n, n), axes=(-2, -1))
    wfft = shift * wfft.reshape(cout, chn, f_total).transpose(2, 0, 1).conj()
    wnorm = jnp.sqrt(jnp.sum(jnp.abs(wfft) ** 2))
    if alpha is None:
        alpha = wnorm
    qfft = _cayley(alpha * wfft / wnorm)                     # (F, cout, chn)

    xfft = jnp.fft.rfft2(scale * x, axes=(-2, -1))
    xfft = xfft.transpose(2, 3, 1, 0).reshape(f_total, cin, batch)

    q1, q2 = qfft[:, :, :cout], qfft[:, :, cout:]
    m = 2.0 * jnp.einsum("fko,fki->foi", jnp.conj(q1), q2,
                         precision=jax.lax.Precision.HIGHEST)
    yfft = jnp.einsum("foi,fib->fob", m, xfft,
                      precision=jax.lax.Precision.HIGHEST)   # (F, cout, B)

    y = jnp.fft.irfft2(yfft.reshape(n, nh, cout, batch).transpose(3, 2, 0, 1),
                       s=(n, n), axes=(-2, -1))
    if bias is not None:
        y = y + bias[None, :, None, None]
    return y


# --------------------------------------------------------------------------- #
if __name__ == "__main__":
    cin, cout, k = 4, 4, 3          # SandwichConvLin: conv in_channels = cin + cout
    n, batch = 16, 2
    chn = cin + cout
    scale = 1.0

    key = jax.random.PRNGKey(0)
    k_w, k_b, k_x = jax.random.split(key, 3)

    fan_in = chn * k * k
    bound = 1.0 / float(np.sqrt(fan_in))
    weight = bound * jax.random.normal(k_w, (cout, chn, k, k), jnp.float32)
    bias = jax.random.uniform(k_b, (cout,), jnp.float32, -bound, bound)
    x = jax.random.normal(k_x, (batch, cin, n, n), jnp.float32)   # NCHW like PyTorch

    out = sandwich_conv_lin(x, weight, bias, alpha=None, scale=scale)
    out = jax.block_until_ready(out)

    ref = sandwich_conv_lin_reference(x, weight, bias, alpha=None, scale=scale)
    assert out.shape == ref.shape == (batch, cout, n, n)
    np.testing.assert_allclose(np.asarray(out), np.asarray(ref), rtol=1e-3, atol=1e-3)
    print("KERNEL_OK")
</pallas_src>

<mosaic_0001>
module attributes {stable_mosaic.version = 11 : i64} {
  func.func @kernel(%arg0: i32, %arg1: i32, %arg2: memref<4x8x128xf32, #tpu.memory_space<vmem>>, %arg3: memref<4x8x128xf32, #tpu.memory_space<vmem>>, %arg4: memref<1x4x128xf32, #tpu.memory_space<vmem>>, %arg5: memref<1x4x128xf32, #tpu.memory_space<vmem>>, %arg6: memref<1x4x128xf32, #tpu.memory_space<vmem>>, %arg7: memref<1x4x128xf32, #tpu.memory_space<vmem>>, %arg8: memref<4x4x128xf32, #tpu.memory_space<vmem>>, %arg9: memref<4x4x128xf32, #tpu.memory_space<vmem>>) attributes {dimension_semantics = [#tpu.dimension_semantics<parallel>, #tpu.dimension_semantics<arbitrary>], iteration_bounds = array<i64: 2, 2>, scalar_prefetch = 0 : i64, scratch_operands = 2 : i64, tpu.core_type = #tpu.core_type<tc>, window_params = [{transform_indices = @transform_0, window_bounds = array<i64: 4, 8, 128>}, {transform_indices = @transform_1, window_bounds = array<i64: 4, 8, 128>}, {transform_indices = @transform_2, window_bounds = array<i64: 1, 4, 128>}, {transform_indices = @transform_3, window_bounds = array<i64: 1, 4, 128>}, {transform_indices = @transform_4, window_bounds = array<i64: 1, 4, 128>}, {transform_indices = @transform_5, window_bounds = array<i64: 1, 4, 128>}]} {
    %c0_i32 = arith.constant 0 : i32
    %0 = arith.cmpi eq, %arg1, %c0_i32 : i32
    %1 = arith.extui %0 : i1 to i32
    %c0_i32_0 = arith.constant 0 : i32
    %2 = arith.cmpi ne, %1, %c0_i32_0 : i32
    scf.if %2 {
      %cst_40 = arith.constant 0.000000e+00 : f32
      %71 = vector.broadcast %cst_40 : f32 to vector<4x128xf32>
      %cst_41 = arith.constant 0.000000e+00 : f32
      %72 = vector.broadcast %cst_41 : f32 to vector<4x128xf32>
      %c0_42 = arith.constant 0 : index
      %c0_43 = arith.constant 0 : index
      %c0_44 = arith.constant 0 : index
      %73 = vector.load %arg2[%c0_42, %c0_43, %c0_44] : memref<4x8x128xf32, #tpu.memory_space<vmem>>, vector<1x1x128xf32>
      %74 = vector.shape_cast %73 : vector<1x1x128xf32> to vector<1x128xf32>
      %c0_45 = arith.constant 0 : index
      %c0_46 = arith.constant 0 : index
      %c0_47 = arith.constant 0 : index
      %75 = vector.load %arg3[%c0_45, %c0_46, %c0_47] : memref<4x8x128xf32, #tpu.memory_space<vmem>>, vector<1x1x128xf32>
      %76 = vector.shape_cast %75 : vector<1x1x128xf32> to vector<1x128xf32>
      %c0_48 = arith.constant 0 : index
      %c4 = arith.constant 4 : index
      %c0_49 = arith.constant 0 : index
      %77 = vector.load %arg2[%c0_48, %c4, %c0_49] : memref<4x8x128xf32, #tpu.memory_space<vmem>>, vector<1x4x128xf32>
      %78 = vector.shape_cast %77 : vector<1x4x128xf32> to vector<4x128xf32>
      %c0_50 = arith.constant 0 : index
      %c4_51 = arith.constant 4 : index
      %c0_52 = arith.constant 0 : index
      %79 = vector.load %arg3[%c0_50, %c4_51, %c0_52] : memref<4x8x128xf32, #tpu.memory_space<vmem>>, vector<1x4x128xf32>
      %80 = vector.shape_cast %79 : vector<1x4x128xf32> to vector<4x128xf32>
      %81 = vector.broadcast %74 : vector<1x128xf32> to vector<4x128xf32>
      %82 = arith.mulf %81, %78 : vector<4x128xf32>
      %83 = arith.addf %71, %82 : vector<4x128xf32>
      %84 = vector.broadcast %76 : vector<1x128xf32> to vector<4x128xf32>
      %85 = arith.mulf %84, %80 : vector<4x128xf32>
      %86 = arith.addf %83, %85 : vector<4x128xf32>
      %87 = vector.broadcast %74 : vector<1x128xf32> to vector<4x128xf32>
      %88 = arith.mulf %87, %80 : vector<4x128xf32>
      %89 = arith.addf %72, %88 : vector<4x128xf32>
      %90 = vector.broadcast %76 : vector<1x128xf32> to vector<4x128xf32>
      %91 = arith.mulf %90, %78 : vector<4x128xf32>
      %92 = arith.subf %89, %91 : vector<4x128xf32>
      %c1_53 = arith.constant 1 : index
      %c0_54 = arith.constant 0 : index
      %c0_55 = arith.constant 0 : index
      %93 = vector.load %arg2[%c1_53, %c0_54, %c0_55] : memref<4x8x128xf32, #tpu.memory_space<vmem>>, vector<1x1x128xf32>
      %94 = vector.shape_cast %93 : vector<1x1x128xf32> to vector<1x128xf32>
      %c1_56 = arith.constant 1 : index
      %c0_57 = arith.constant 0 : index
      %c0_58 = arith.constant 0 : index
      %95 = vector.load %arg3[%c1_56, %c0_57, %c0_58] : memref<4x8x128xf32, #tpu.memory_space<vmem>>, vector<1x1x128xf32>
      %96 = vector.shape_cast %95 : vector<1x1x128xf32> to vector<1x128xf32>
      %c1_59 = arith.constant 1 : index
      %c4_60 = arith.constant 4 : index
      %c0_61 = arith.constant 0 : index
      %97 = vector.load %arg2[%c1_59, %c4_60, %c0_61] : memref<4x8x128xf32, #tpu.memory_space<vmem>>, vector<1x4x128xf32>
      %98 = vector.shape_cast %97 : vector<1x4x128xf32> to vector<4x128xf32>
      %c1_62 = arith.constant 1 : index
      %c4_63 = arith.constant 4 : index
      %c0_64 = arith.constant 0 : index
      %99 = vector.load %arg3[%c1_62, %c4_63, %c0_64] : memref<4x8x128xf32, #tpu.memory_space<vmem>>, vector<1x4x128xf32>
      %100 = vector.shape_cast %99 : vector<1x4x128xf32> to vector<4x128xf32>
      %101 = vector.broadcast %94 : vector<1x128xf32> to vector<4x128xf32>
      %102 = arith.mulf %101, %98 : vector<4x128xf32>
      %103 = arith.addf %86, %102 : vector<4x128xf32>
      %104 = vector.broadcast %96 : vector<1x128xf32> to vector<4x128xf32>
      %105 = arith.mulf %104, %100 : vector<4x128xf32>
      %106 = arith.addf %103, %105 : vector<4x128xf32>
      %107 = vector.broadcast %94 : vector<1x128xf32> to vector<4x128xf32>
      %108 = arith.mulf %107, %100 : vector<4x128xf32>
      %109 = arith.addf %92, %108 : vector<4x128xf32>
      %110 = vector.broadcast %96 : vector<1x128xf32> to vector<4x128xf32>
      %111 = arith.mulf %110, %98 : vector<4x128xf32>
      %112 = arith.subf %109, %111 : vector<4x128xf32>
      %c2_65 = arith.constant 2 : index
      %c0_66 = arith.constant 0 : index
      %c0_67 = arith.constant 0 : index
      %113 = vector.load %arg2[%c2_65, %c0_66, %c0_67] : memref<4x8x128xf32, #tpu.memory_space<vmem>>, vector<1x1x128xf32>
      %114 = vector.shape_cast %113 : vector<1x1x128xf32> to vector<1x128xf32>
      %c2_68 = arith.constant 2 : index
      %c0_69 = arith.constant 0 : index
      %c0_70 = arith.constant 0 : index
      %115 = vector.load %arg3[%c2_68, %c0_69, %c0_70] : memref<4x8x128xf32, #tpu.memory_space<vmem>>, vector<1x1x128xf32>
      %116 = vector.shape_cast %115 : vector<1x1x128xf32> to vector<1x128xf32>
      %c2_71 = arith.constant 2 : index
      %c4_72 = arith.constant 4 : index
      %c0_73 = arith.constant 0 : index
      %117 = vector.load %arg2[%c2_71, %c4_72, %c0_73] : memref<4x8x128xf32, #tpu.memory_space<vmem>>, vector<1x4x128xf32>
      %118 = vector.shape_cast %117 : vector<1x4x128xf32> to vector<4x128xf32>
      %c2_74 = arith.constant 2 : index
      %c4_75 = arith.constant 4 : index
      %c0_76 = arith.constant 0 : index
      %119 = vector.load %arg3[%c2_74, %c4_75, %c0_76] : memref<4x8x128xf32, #tpu.memory_space<vmem>>, vector<1x4x128xf32>
      %120 = vector.shape_cast %119 : vector<1x4x128xf32> to vector<4x128xf32>
      %121 = vector.broadcast %114 : vector<1x128xf32> to vector<4x128xf32>
      %122 = arith.mulf %121, %118 : vector<4x128xf32>
      %123 = arith.addf %106, %122 : vector<4x128xf32>
      %124 = vector.broadcast %116 : vector<1x128xf32> to vector<4x128xf32>
      %125 = arith.mulf %124, %120 : vector<4x128xf32>
      %126 = arith.addf %123, %125 : vector<4x128xf32>
      %127 = vector.broadcast %114 : vector<1x128xf32> to vector<4x128xf32>
      %128 = arith.mulf %127, %120 : vector<4x128xf32>
      %129 = arith.addf %112, %128 : vector<4x128xf32>
      %130 = vector.broadcast %116 : vector<1x128xf32> to vector<4x128xf32>
      %131 = arith.mulf %130, %118 : vector<4x128xf32>
      %132 = arith.subf %129, %131 : vector<4x128xf32>
      %c3_77 = arith.constant 3 : index
      %c0_78 = arith.constant 0 : index
      %c0_79 = arith.constant 0 : index
      %133 = vector.load %arg2[%c3_77, %c0_78, %c0_79] : memref<4x8x128xf32, #tpu.memory_space<vmem>>, vector<1x1x128xf32>
      %134 = vector.shape_cast %133 : vector<1x1x128xf32> to vector<1x128xf32>
      %c3_80 = arith.constant 3 : index
      %c0_81 = arith.constant 0 : index
      %c0_82 = arith.constant 0 : index
      %135 = vector.load %arg3[%c3_80, %c0_81, %c0_82] : memref<4x8x128xf32, #tpu.memory_space<vmem>>, vector<1x1x128xf32>
      %136 = vector.shape_cast %135 : vector<1x1x128xf32> to vector<1x128xf32>
      %c3_83 = arith.constant 3 : index
      %c4_84 = arith.constant 4 : index
      %c0_85 = arith.constant 0 : index
      %137 = vector.load %arg2[%c3_83, %c4_84, %c0_85] : memref<4x8x128xf32, #tpu.memory_space<vmem>>, vector<1x4x128xf32>
      %138 = vector.shape_cast %137 : vector<1x4x128xf32> to vector<4x128xf32>
      %c3_86 = arith.constant 3 : index
      %c4_87 = arith.constant 4 : index
      %c0_88 = arith.constant 0 : index
      %139 = vector.load %arg3[%c3_86, %c4_87, %c0_88] : memref<4x8x128xf32, #tpu.memory_space<vmem>>, vector<1x4x128xf32>
      %140 = vector.shape_cast %139 : vector<1x4x128xf32> to vector<4x128xf32>
      %141 = vector.broadcast %134 : vector<1x128xf32> to vector<4x128xf32>
      %142 = arith.mulf %141, %138 : vector<4x128xf32>
      %143 = arith.addf %126, %142 : vector<4x128xf32>
      %144 = vector.broadcast %136 : vector<1x128xf32> to vector<4x128xf32>
      %145 = arith.mulf %144, %140 : vector<4x128xf32>
      %146 = arith.addf %143, %145 : vector<4x128xf32>
      %147 = vector.broadcast %134 : vector<1x128xf32> to vector<4x128xf32>
      %148 = arith.mulf %147, %140 : vector<4x128xf32>
      %149 = arith.addf %132, %148 : vector<4x128xf32>
      %150 = vector.broadcast %136 : vector<1x128xf32> to vector<4x128xf32>
      %151 = arith.mulf %150, %138 : vector<4x128xf32>
      %152 = arith.subf %149, %151 : vector<4x128xf32>
      %cst_89 = arith.constant 2.000000e+00 : f32
      %153 = vector.broadcast %cst_89 : f32 to vector<4x128xf32>
      %154 = arith.mulf %153, %146 : vector<4x128xf32>
      %c0_90 = arith.constant 0 : index
      %c0_91 = arith.constant 0 : index
      %c0_92 = arith.constant 0 : index
      %155 = vector.load %arg8[%c0_90, %c0_91, %c0_92] : memref<4x4x128xf32, #tpu.memory_space<vmem>>, vector<1x4x128xf32>
      %156 = vector.shape_cast %155 : vector<1x4x128xf32> to vector<4x128xf32>
      %157 = vector.shape_cast %154 : vector<4x128xf32> to vector<1x4x128xf32>
      tpu.vector_store %arg8[%c0_90, %c0_91, %c0_92], %157 {strides = array<i32>} : memref<4x4x128xf32, #tpu.memory_space<vmem>>, vector<1x4x128xf32>,
      %cst_93 = arith.constant 2.000000e+00 : f32
      %158 = vector.broadcast %cst_93 : f32 to vector<4x128xf32>
      %159 = arith.mulf %158, %152 : vector<4x128xf32>
      %c0_94 = arith.constant 0 : index
      %c0_95 = arith.constant 0 : index
      %c0_96 = arith.constant 0 : index
      %160 = vector.load %arg9[%c0_94, %c0_95, %c0_96] : memref<4x4x128xf32, #tpu.memory_space<vmem>>, vector<1x4x128xf32>
      %161 = vector.shape_cast %160 : vector<1x4x128xf32> to vector<4x128xf32>
      %162 = vector.shape_cast %159 : vector<4x128xf32> to vector<1x4x128xf32>
      tpu.vector_store %arg9[%c0_94, %c0_95, %c0_96], %162 {strides = array<i32>} : memref<4x4x128xf32, #tpu.memory_space<vmem>>, vector<1x4x128xf32>,
      %cst_97 = arith.constant 0.000000e+00 : f32
      %163 = vector.broadcast %cst_97 : f32 to vector<4x128xf32>
      %cst_98 = arith.constant 0.000000e+00 : f32
      %164 = vector.broadcast %cst_98 : f32 to vector<4x128xf32>
      %c0_99 = arith.constant 0 : index
      %c1_100 = arith.constant 1 : index
      %c0_101 = arith.constant 0 : index
      %165 = vector.load %arg2[%c0_99, %c1_100, %c0_101] : memref<4x8x128xf32, #tpu.memory_space<vmem>>, vector<1x1x128xf32>
      %166 = vector.shape_cast %165 : vector<1x1x128xf32> to vector<1x128xf32>
      %c0_102 = arith.constant 0 : index
      %c1_103 = arith.constant 1 : index
      %c0_104 = arith.constant 0 : index
      %167 = vector.load %arg3[%c0_102, %c1_103, %c0_104] : memref<4x8x128xf32, #tpu.memory_space<vmem>>, vector<1x1x128xf32>
      %168 = vector.shape_cast %167 : vector<1x1x128xf32> to vector<1x128xf32>
      %c0_105 = arith.constant 0 : index
      %c4_106 = arith.constant 4 : index
      %c0_107 = arith.constant 0 : index
      %169 = vector.load %arg2[%c0_105, %c4_106, %c0_107] : memref<4x8x128xf32, #tpu.memory_space<vmem>>, vector<1x4x128xf32>
      %170 = vector.shape_cast %169 : vector<1x4x128xf32> to vector<4x128xf32>
      %c0_108 = arith.constant 0 : index
      %c4_109 = arith.constant 4 : index
      %c0_110 = arith.constant 0 : index
      %171 = vector.load %arg3[%c0_108, %c4_109, %c0_110] : memref<4x8x128xf32, #tpu.memory_space<vmem>>, vector<1x4x128xf32>
      %172 = vector.shape_cast %171 : vector<1x4x128xf32> to vector<4x128xf32>
      %173 = vector.broadcast %166 : vector<1x128xf32> to vector<4x128xf32>
      %174 = arith.mulf %173, %170 : vector<4x128xf32>
      %175 = arith.addf %163, %174 : vector<4x128xf32>
      %176 = vector.broadcast %168 : vector<1x128xf32> to vector<4x128xf32>
      %177 = arith.mulf %176, %172 : vector<4x128xf32>
      %178 = arith.addf %175, %177 : vector<4x128xf32>
      %179 = vector.broadcast %166 : vector<1x128xf32> to vector<4x128xf32>
      %180 = arith.mulf %179, %172 : vector<4x128xf32>
      %181 = arith.addf %164, %180 : vector<4x128xf32>
      %182 = vector.broadcast %168 : vector<1x128xf32> to vector<4x128xf32>
      %183 = arith.mulf %182, %170 : vector<4x128xf32>
      %184 = arith.subf %181, %183 : vector<4x128xf32>
      %c1_111 = arith.constant 1 : index
      %c1_112 = arith.constant 1 : index
      %c0_113 = arith.constant 0 : index
      %185 = vector.load %arg2[%c1_111, %c1_112, %c0_113] : memref<4x8x128xf32, #tpu.memory_space<vmem>>, vector<1x1x128xf32>
      %186 = vector.shape_cast %185 : vector<1x1x128xf32> to vector<1x128xf32>
      %c1_114 = arith.constant 1 : index
      %c1_115 = arith.constant 1 : index
      %c0_116 = arith.constant 0 : index
      %187 = vector.load %arg3[%c1_114, %c1_115, %c0_116] : memref<4x8x128xf32, #tpu.memory_space<vmem>>, vector<1x1x128xf32>
      %188 = vector.shape_cast %187 : vector<1x1x128xf32> to vector<1x128xf32>
      %c1_117 = arith.constant 1 : index
      %c4_118 = arith.constant 4 : index
      %c0_119 = arith.constant 0 : index
      %189 = vector.load %arg2[%c1_117, %c4_118, %c0_119] : memref<4x8x128xf32, #tpu.memory_space<vmem>>, vector<1x4x128xf32>
      %190 = vector.shape_cast %189 : vector<1x4x128xf32> to vector<4x128xf32>
      %c1_120 = arith.constant 1 : index
      %c4_121 = arith.constant 4 : index
      %c0_122 = arith.constant 0 : index
      %191 = vector.load %arg3[%c1_120, %c4_121, %c0_122] : memref<4x8x128xf32, #tpu.memory_space<vmem>>, vector<1x4x128xf32>
      %192 = vector.shape_cast %191 : vector<1x4x128xf32> to vector<4x128xf32>
      %193 = vector.broadcast %186 : vector<1x128xf32> to vector<4x128xf32>
      %194 = arith.mulf %193, %190 : vector<4x128xf32>
      %195 = arith.addf %178, %194 : vector<4x128xf32>
      %196 = vector.broadcast %188 : vector<1x128xf32> to vector<4x128xf32>
      %197 = arith.mulf %196, %192 : vector<4x128xf32>
      %198 = arith.addf %195, %197 : vector<4x128xf32>
      %199 = vector.broadcast %186 : vector<1x128xf32> to vector<4x128xf32>
      %200 = arith.mulf %199, %192 : vector<4x128xf32>
      %201 = arith.addf %184, %200 : vector<4x128xf32>
      %202 = vector.broadcast %188 : vector<1x128xf32> to vector<4x128xf32>
      %203 = arith.mulf %202, %190 : vector<4x128xf32>
      %204 = arith.subf %201, %203 : vector<4x128xf32>
      %c2_123 = arith.constant 2 : index
      %c1_124 = arith.constant 1 : index
      %c0_125 = arith.constant 0 : index
      %205 = vector.load %arg2[%c2_123, %c1_124, %c0_125] : memref<4x8x128xf32, #tpu.memory_space<vmem>>, vector<1x1x128xf32>
      %206 = vector.shape_cast %205 : vector<1x1x128xf32> to vector<1x128xf32>
      %c2_126 = arith.constant 2 : index
      %c1_127 = arith.constant 1 : index
      %c0_128 = arith.constant 0 : index
      %207 = vector.load %arg3[%c2_126, %c1_127, %c0_128] : memref<4x8x128xf32, #tpu.memory_space<vmem>>, vector<1x1x128xf32>
      %208 = vector.shape_cast %207 : vector<1x1x128xf32> to vector<1x128xf32>
      %c2_129 = arith.constant 2 : index
      %c4_130 = arith.constant 4 : index
      %c0_131 = arith.constant 0 : index
      %209 = vector.load %arg2[%c2_129, %c4_130, %c0_131] : memref<4x8x128xf32, #tpu.memory_space<vmem>>, vector<1x4x128xf32>
      %210 = vector.shape_cast %209 : vector<1x4x128xf32> to vector<4x128xf32>
      %c2_132 = arith.constant 2 : index
      %c4_133 = arith.constant 4 : index
      %c0_134 = arith.constant 0 : index
      %211 = vector.load %arg3[%c2_132, %c4_133, %c0_134] : memref<4x8x128xf32, #tpu.memory_space<vmem>>, vector<1x4x128xf32>
      %212 = vector.shape_cast %211 : vector<1x4x128xf32> to vector<4x128xf32>
      %213 = vector.broadcast %206 : vector<1x128xf32> to vector<4x128xf32>
      %214 = arith.mulf %213, %210 : vector<4x128xf32>
      %215 = arith.addf %198, %214 : vector<4x128xf32>
      %216 = vector.broadcast %208 : vector<1x128xf32> to vector<4x128xf32>
      %217 = arith.mulf %216, %212 : vector<4x128xf32>
      %218 = arith.addf %215, %217 : vector<4x128xf32>
      %219 = vector.broadcast %206 : vector<1x128xf32> to vector<4x128xf32>
      %220 = arith.mulf %219, %212 : vector<4x128xf32>
      %221 = arith.addf %204, %220 : vector<4x128xf32>
      %222 = vector.broadcast %208 : vector<1x128xf32> to vector<4x128xf32>
      %223 = arith.mulf %222, %210 : vector<4x128xf32>
      %224 = arith.subf %221, %223 : vector<4x128xf32>
      %c3_135 = arith.constant 3 : index
      %c1_136 = arith.constant 1 : index
      %c0_137 = arith.constant 0 : index
      %225 = vector.load %arg2[%c3_135, %c1_136, %c0_137] : memref<4x8x128xf32, #tpu.memory_space<vmem>>, vector<1x1x128xf32>
      %226 = vector.shape_cast %225 : vector<1x1x128xf32> to vector<1x128xf32>
      %c3_138 = arith.constant 3 : index
      %c1_139 = arith.constant 1 : index
      %c0_140 = arith.constant 0 : index
      %227 = vector.load %arg3[%c3_138, %c1_139, %c0_140] : memref<4x8x128xf32, #tpu.memory_space<vmem>>, vector<1x1x128xf32>
      %228 = vector.shape_cast %227 : vector<1x1x128xf32> to vector<1x128xf32>
      %c3_141 = arith.constant 3 : index
      %c4_142 = arith.constant 4 : index
      %c0_143 = arith.constant 0 : index
      %229 = vector.load %arg2[%c3_141, %c4_142, %c0_143] : memref<4x8x128xf32, #tpu.memory_space<vmem>>, vector<1x4x128xf32>
      %230 = vector.shape_cast %229 : vector<1x4x128xf32> to vector<4x128xf32>
      %c3_144 = arith.constant 3 : index
      %c4_145 = arith.constant 4 : index
      %c0_146 = arith.constant 0 : index
      %231 = vector.load %arg3[%c3_144, %c4_145, %c0_146] : memref<4x8x128xf32, #tpu.memory_space<vmem>>, vector<1x4x128xf32>
      %232 = vector.shape_cast %231 : vector<1x4x128xf32> to vector<4x128xf32>
      %233 = vector.broadcast %226 : vector<1x128xf32> to vector<4x128xf32>
      %234 = arith.mulf %233, %230 : vector<4x128xf32>
      %235 = arith.addf %218, %234 : vector<4x128xf32>
      %236 = vector.broadcast %228 : vector<1x128xf32> to vector<4x128xf32>
      %237 = arith.mulf %236, %232 : vector<4x128xf32>
      %238 = arith.addf %235, %237 : vector<4x128xf32>
      %239 = vector.broadcast %226 : vector<1x128xf32> to vector<4x128xf32>
      %240 = arith.mulf %239, %232 : vector<4x128xf32>
      %241 = arith.addf %224, %240 : vector<4x128xf32>
      %242 = vector.broadcast %228 : vector<1x128xf32> to vector<4x128xf32>
      %243 = arith.mulf %242, %230 : vector<4x128xf32>
      %244 = arith.subf %241, %243 : vector<4x128xf32>
      %cst_147 = arith.constant 2.000000e+00 : f32
      %245 = vector.broadcast %cst_147 : f32 to vector<4x128xf32>
      %246 = arith.mulf %245, %238 : vector<4x128xf32>
      %c1_148 = arith.constant 1 : index
      %c0_149 = arith.constant 0 : index
      %c0_150 = arith.constant 0 : index
      %247 = vector.load %arg8[%c1_148, %c0_149, %c0_150] : memref<4x4x128xf32, #tpu.memory_space<vmem>>, vector<1x4x128xf32>
      %248 = vector.shape_cast %247 : vector<1x4x128xf32> to vector<4x128xf32>
      %249 = vector.shape_cast %246 : vector<4x128xf32> to vector<1x4x128xf32>
      tpu.vector_store %arg8[%c1_148, %c0_149, %c0_150], %249 {strides = array<i32>} : memref<4x4x128xf32, #tpu.memory_space<vmem>>, vector<1x4x128xf32>,
      %cst_151 = arith.constant 2.000000e+00 : f32
      %250 = vector.broadcast %cst_151 : f32 to vector<4x128xf32>
      %251 = arith.mulf %250, %244 : vector<4x128xf32>
      %c1_152 = arith.constant 1 : index
      %c0_153 = arith.constant 0 : index
      %c0_154 = arith.constant 0 : index
      %252 = vector.load %arg9[%c1_152, %c0_153, %c0_154] : memref<4x4x128xf32, #tpu.memory_space<vmem>>, vector<1x4x128xf32>
      %253 = vector.shape_cast %252 : vector<1x4x128xf32> to vector<4x128xf32>
      %254 = vector.shape_cast %251 : vector<4x128xf32> to vector<1x4x128xf32>
      tpu.vector_store %arg9[%c1_152, %c0_153, %c0_154], %254 {strides = array<i32>} : memref<4x4x128xf32, #tpu.memory_space<vmem>>, vector<1x4x128xf32>,
      %cst_155 = arith.constant 0.000000e+00 : f32
      %255 = vector.broadcast %cst_155 : f32 to vector<4x128xf32>
      %cst_156 = arith.constant 0.000000e+00 : f32
      %256 = vector.broadcast %cst_156 : f32 to vector<4x128xf32>
      %c0_157 = arith.constant 0 : index
      %c2_158 = arith.constant 2 : index
      %c0_159 = arith.constant 0 : index
      %257 = vector.load %arg2[%c0_157, %c2_158, %c0_159] : memref<4x8x128xf32, #tpu.memory_space<vmem>>, vector<1x1x128xf32>
      %258 = vector.shape_cast %257 : vector<1x1x128xf32> to vector<1x128xf32>
      %c0_160 = arith.constant 0 : index
      %c2_161 = arith.constant 2 : index
      %c0_162 = arith.constant 0 : index
      %259 = vector.load %arg3[%c0_160, %c2_161, %c0_162] : memref<4x8x128xf32, #tpu.memory_space<vmem>>, vector<1x1x128xf32>
      %260 = vector.shape_cast %259 : vector<1x1x128xf32> to vector<1x128xf32>
      %c0_163 = arith.constant 0 : index
      %c4_164 = arith.constant 4 : index
      %c0_165 = arith.constant 0 : index
      %261 = vector.load %arg2[%c0_163, %c4_164, %c0_165] : memref<4x8x128xf32, #tpu.memory_space<vmem>>, vector<1x4x128xf32>
      %262 = vector.shape_cast %261 : vector<1x4x128xf32> to vector<4x128xf32>
      %c0_166 = arith.constant 0 : index
      %c4_167 = arith.constant 4 : index
      %c0_168 = arith.constant 0 : index
      %263 = vector.load %arg3[%c0_166, %c4_167, %c0_168] : memref<4x8x128xf32, #tpu.memory_space<vmem>>, vector<1x4x128xf32>
      %264 = vector.shape_cast %263 : vector<1x4x128xf32> to vector<4x128xf32>
      %265 = vector.broadcast %258 : vector<1x128xf32> to vector<4x128xf32>
      %266 = arith.mulf %265, %262 : vector<4x128xf32>
      %267 = arith.addf %255, %266 : vector<4x128xf32>
      %268 = vector.broadcast %260 : vector<1x128xf32> to vector<4x128xf32>
      %269 = arith.mulf %268, %264 : vector<4x128xf32>
      %270 = arith.addf %267, %269 : vector<4x128xf32>
      %271 = vector.broadcast %258 : vector<1x128xf32> to vector<4x128xf32>
      %272 = arith.mulf %271, %264 : vector<4x128xf32>
      %273 = arith.addf %256, %272 : vector<4x128xf32>
      %274 = vector.broadcast %260 : vector<1x128xf32> to vector<4x128xf32>
      %275 = arith.mulf %274, %262 : vector<4x128xf32>
      %276 = arith.subf %273, %275 : vector<4x128xf32>
      %c1_169 = arith.constant 1 : index
      %c2_170 = arith.constant 2 : index
      %c0_171 = arith.constant 0 : index
      %277 = vector.load %arg2[%c1_169, %c2_170, %c0_171] : memref<4x8x128xf32, #tpu.memory_space<vmem>>, vector<1x1x128xf32>
      %278 = vector.shape_cast %277 : vector<1x1x128xf32> to vector<1x128xf32>
      %c1_172 = arith.constant 1 : index
      %c2_173 = arith.constant 2 : index
      %c0_174 = arith.constant 0 : index
      %279 = vector.load %arg3[%c1_172, %c2_173, %c0_174] : memref<4x8x128xf32, #tpu.memory_space<vmem>>, vector<1x1x128xf32>
      %280 = vector.shape_cast %279 : vector<1x1x128xf32> to vector<1x128xf32>
      %c1_175 = arith.constant 1 : index
      %c4_176 = arith.constant 4 : index
      %c0_177 = arith.constant 0 : index
      %281 = vector.load %arg2[%c1_175, %c4_176, %c0_177] : memref<4x8x128xf32, #tpu.memory_space<vmem>>, vector<1x4x128xf32>
      %282 = vector.shape_cast %281 : vector<1x4x128xf32> to vector<4x128xf32>
      %c1_178 = arith.constant 1 : index
      %c4_179 = arith.constant 4 : index
      %c0_180 = arith.constant 0 : index
      %283 = vector.load %arg3[%c1_178, %c4_179, %c0_180] : memref<4x8x128xf32, #tpu.memory_space<vmem>>, vector<1x4x128xf32>
      %284 = vector.shape_cast %283 : vector<1x4x128xf32> to vector<4x128xf32>
      %285 = vector.broadcast %278 : vector<1x128xf32> to vector<4x128xf32>
      %286 = arith.mulf %285, %282 : vector<4x128xf32>
      %287 = arith.addf %270, %286 : vector<4x128xf32>
      %288 = vector.broadcast %280 : vector<1x128xf32> to vector<4x128xf32>
      %289 = arith.mulf %288, %284 : vector<4x128xf32>
      %290 = arith.addf %287, %289 : vector<4x128xf32>
      %291 = vector.broadcast %278 : vector<1x128xf32> to vector<4x128xf32>
      %292 = arith.mulf %291, %284 : vector<4x128xf32>
      %293 = arith.addf %276, %292 : vector<4x128xf32>
      %294 = vector.broadcast %280 : vector<1x128xf32> to vector<4x128xf32>
      %295 = arith.mulf %294, %282 : vector<4x128xf32>
      %296 = arith.subf %293, %295 : vector<4x128xf32>
      %c2_181 = arith.constant 2 : index
      %c2_182 = arith.constant 2 : index
      %c0_183 = arith.constant 0 : index
      %297 = vector.load %arg2[%c2_181, %c2_182, %c0_183] : memref<4x8x128xf32, #tpu.memory_space<vmem>>, vector<1x1x128xf32>
      %298 = vector.shape_cast %297 : vector<1x1x128xf32> to vector<1x128xf32>
      %c2_184 = arith.constant 2 : index
      %c2_185 = arith.constant 2 : index
      %c0_186 = arith.constant 0 : index
      %299 = vector.load %arg3[%c2_184, %c2_185, %c0_186] : memref<4x8x128xf32, #tpu.memory_space<vmem>>, vector<1x1x128xf32>
      %300 = vector.shape_cast %299 : vector<1x1x128xf32> to vector<1x128xf32>
      %c2_187 = arith.constant 2 : index
      %c4_188 = arith.constant 4 : index
      %c0_189 = arith.constant 0 : index
      %301 = vector.load %arg2[%c2_187, %c4_188, %c0_189] : memref<4x8x128xf32, #tpu.memory_space<vmem>>, vector<1x4x128xf32>
      %302 = vector.shape_cast %301 : vector<1x4x128xf32> to vector<4x128xf32>
      %c2_190 = arith.constant 2 : index
      %c4_191 = arith.constant 4 : index
      %c0_192 = arith.constant 0 : index
      %303 = vector.load %arg3[%c2_190, %c4_191, %c0_192] : memref<4x8x128xf32, #tpu.memory_space<vmem>>, vector<1x4x128xf32>
      %304 = vector.shape_cast %303 : vector<1x4x128xf32> to vector<4x128xf32>
      %305 = vector.broadcast %298 : vector<1x128xf32> to vector<4x128xf32>
      %306 = arith.mulf %305, %302 : vector<4x128xf32>
      %307 = arith.addf %290, %306 : vector<4x128xf32>
      %308 = vector.broadcast %300 : vector<1x128xf32> to vector<4x128xf32>
      %309 = arith.mulf %308, %304 : vector<4x128xf32>
      %310 = arith.addf %307, %309 : vector<4x128xf32>
      %311 = vector.broadcast %298 : vector<1x128xf32> to vector<4x128xf32>
      %312 = arith.mulf %311, %304 : vector<4x128xf32>
      %313 = arith.addf %296, %312 : vector<4x128xf32>
      %314 = vector.broadcast %300 : vector<1x128xf32> to vector<4x128xf32>
      %315 = arith.mulf %314, %302 : vector<4x128xf32>
      %316 = arith.subf %313, %315 : vector<4x128xf32>
      %c3_193 = arith.constant 3 : index
      %c2_194 = arith.constant 2 : index
      %c0_195 = arith.constant 0 : index
      %317 = vector.load %arg2[%c3_193, %c2_194, %c0_195] : memref<4x8x128xf32, #tpu.memory_space<vmem>>, vector<1x1x128xf32>
      %318 = vector.shape_cast %317 : vector<1x1x128xf32> to vector<1x128xf32>
      %c3_196 = arith.constant 3 : index
      %c2_197 = arith.constant 2 : index
      %c0_198 = arith.constant 0 : index
      %319 = vector.load %arg3[%c3_196, %c2_197, %c0_198] : memref<4x8x128xf32, #tpu.memory_space<vmem>>, vector<1x1x128xf32>
      %320 = vector.shape_cast %319 : vector<1x1x128xf32> to vector<1x128xf32>
      %c3_199 = arith.constant 3 : index
      %c4_200 = arith.constant 4 : index
      %c0_201 = arith.constant 0 : index
      %321 = vector.load %arg2[%c3_199, %c4_200, %c0_201] : memref<4x8x128xf32, #tpu.memory_space<vmem>>, vector<1x4x128xf32>
      %322 = vector.shape_cast %321 : vector<1x4x128xf32> to vector<4x128xf32>
      %c3_202 = arith.constant 3 : index
      %c4_203 = arith.constant 4 : index
      %c0_204 = arith.constant 0 : index
      %323 = vector.load %arg3[%c3_202, %c4_203, %c0_204] : memref<4x8x128xf32, #tpu.memory_space<vmem>>, vector<1x4x128xf32>
      %324 = vector.shape_cast %323 : vector<1x4x128xf32> to vector<4x128xf32>
      %325 = vector.broadcast %318 : vector<1x128xf32> to vector<4x128xf32>
      %326 = arith.mulf %325, %322 : vector<4x128xf32>
      %327 = arith.addf %310, %326 : vector<4x128xf32>
      %328 = vector.broadcast %320 : vector<1x128xf32> to vector<4x128xf32>
      %329 = arith.mulf %328, %324 : vector<4x128xf32>
      %330 = arith.addf %327, %329 : vector<4x128xf32>
      %331 = vector.broadcast %318 : vector<1x128xf32> to vector<4x128xf32>
      %332 = arith.mulf %331, %324 : vector<4x128xf32>
      %333 = arith.addf %316, %332 : vector<4x128xf32>
      %334 = vector.broadcast %320 : vector<1x128xf32> to vector<4x128xf32>
      %335 = arith.mulf %334, %322 : vector<4x128xf32>
      %336 = arith.subf %333, %335 : vector<4x128xf32>
      %cst_205 = arith.constant 2.000000e+00 : f32
      %337 = vector.broadcast %cst_205 : f32 to vector<4x128xf32>
      %338 = arith.mulf %337, %330 : vector<4x128xf32>
      %c2_206 = arith.constant 2 : index
      %c0_207 = arith.constant 0 : index
      %c0_208 = arith.constant 0 : index
      %339 = vector.load %arg8[%c2_206, %c0_207, %c0_208] : memref<4x4x128xf32, #tpu.memory_space<vmem>>, vector<1x4x128xf32>
      %340 = vector.shape_cast %339 : vector<1x4x128xf32> to vector<4x128xf32>
      %341 = vector.shape_cast %338 : vector<4x128xf32> to vector<1x4x128xf32>
      tpu.vector_store %arg8[%c2_206, %c0_207, %c0_208], %341 {strides = array<i32>} : memref<4x4x128xf32, #tpu.memory_space<vmem>>, vector<1x4x128xf32>,
      %cst_209 = arith.constant 2.000000e+00 : f32
      %342 = vector.broadcast %cst_209 : f32 to vector<4x128xf32>
      %343 = arith.mulf %342, %336 : vector<4x128xf32>
      %c2_210 = arith.constant 2 : index
      %c0_211 = arith.constant 0 : index
      %c0_212 = arith.constant 0 : index
      %344 = vector.load %arg9[%c2_210, %c0_211, %c0_212] : memref<4x4x128xf32, #tpu.memory_space<vmem>>, vector<1x4x128xf32>
      %345 = vector.shape_cast %344 : vector<1x4x128xf32> to vector<4x128xf32>
      %346 = vector.shape_cast %343 : vector<4x128xf32> to vector<1x4x128xf32>
      tpu.vector_store %arg9[%c2_210, %c0_211, %c0_212], %346 {strides = array<i32>} : memref<4x4x128xf32, #tpu.memory_space<vmem>>, vector<1x4x128xf32>,
      %cst_213 = arith.constant 0.000000e+00 : f32
      %347 = vector.broadcast %cst_213 : f32 to vector<4x128xf32>
      %cst_214 = arith.constant 0.000000e+00 : f32
      %348 = vector.broadcast %cst_214 : f32 to vector<4x128xf32>
      %c0_215 = arith.constant 0 : index
      %c3_216 = arith.constant 3 : index
      %c0_217 = arith.constant 0 : index
      %349 = vector.load %arg2[%c0_215, %c3_216, %c0_217] : memref<4x8x128xf32, #tpu.memory_space<vmem>>, vector<1x1x128xf32>
      %350 = vector.shape_cast %349 : vector<1x1x128xf32> to vector<1x128xf32>
      %c0_218 = arith.constant 0 : index
      %c3_219 = arith.constant 3 : index
      %c0_220 = arith.constant 0 : index
      %351 = vector.load %arg3[%c0_218, %c3_219, %c0_220] : memref<4x8x128xf32, #tpu.memory_space<vmem>>, vector<1x1x128xf32>
      %352 = vector.shape_cast %351 : vector<1x1x128xf32> to vector<1x128xf32>
      %c0_221 = arith.constant 0 : index
      %c4_222 = arith.constant 4 : index
      %c0_223 = arith.constant 0 : index
      %353 = vector.load %arg2[%c0_221, %c4_222, %c0_223] : memref<4x8x128xf32, #tpu.memory_space<vmem>>, vector<1x4x128xf32>
      %354 = vector.shape_cast %353 : vector<1x4x128xf32> to vector<4x128xf32>
      %c0_224 = arith.constant 0 : index
      %c4_225 = arith.constant 4 : index
      %c0_226 = arith.constant 0 : index
      %355 = vector.load %arg3[%c0_224, %c4_225, %c0_226] : memref<4x8x128xf32, #tpu.memory_space<vmem>>, vector<1x4x128xf32>
      %356 = vector.shape_cast %355 : vector<1x4x128xf32> to vector<4x128xf32>
      %357 = vector.broadcast %350 : vector<1x128xf32> to vector<4x128xf32>
      %358 = arith.mulf %357, %354 : vector<4x128xf32>
      %359 = arith.addf %347, %358 : vector<4x128xf32>
      %360 = vector.broadcast %352 : vector<1x128xf32> to vector<4x128xf32>
      %361 = arith.mulf %360, %356 : vector<4x128xf32>
      %362 = arith.addf %359, %361 : vector<4x128xf32>
      %363 = vector.broadcast %350 : vector<1x128xf32> to vector<4x128xf32>
      %364 = arith.mulf %363, %356 : vector<4x128xf32>
      %365 = arith.addf %348, %364 : vector<4x128xf32>
      %366 = vector.broadcast %352 : vector<1x128xf32> to vector<4x128xf32>
      %367 = arith.mulf %366, %354 : vector<4x128xf32>
      %368 = arith.subf %365, %367 : vector<4x128xf32>
      %c1_227 = arith.constant 1 : index
      %c3_228 = arith.constant 3 : index
      %c0_229 = arith.constant 0 : index
      %369 = vector.load %arg2[%c1_227, %c3_228, %c0_229] : memref<4x8x128xf32, #tpu.memory_space<vmem>>, vector<1x1x128xf32>
      %370 = vector.shape_cast %369 : vector<1x1x128xf32> to vector<1x128xf32>
      %c1_230 = arith.constant 1 : index
      %c3_231 = arith.constant 3 : index
      %c0_232 = arith.constant 0 : index
      %371 = vector.load %arg3[%c1_230, %c3_231, %c0_232] : memref<4x8x128xf32, #tpu.memory_space<vmem>>, vector<1x1x128xf32>
      %372 = vector.shape_cast %371 : vector<1x1x128xf32> to vector<1x128xf32>
      %c1_233 = arith.constant 1 : index
      %c4_234 = arith.constant 4 : index
      %c0_235 = arith.constant 0 : index
      %373 = vector.load %arg2[%c1_233, %c4_234, %c0_235] : memref<4x8x128xf32, #tpu.memory_space<vmem>>, vector<1x4x128xf32>
      %374 = vector.shape_cast %373 : vector<1x4x128xf32> to vector<4x128xf32>
      %c1_236 = arith.constant 1 : index
      %c4_237 = arith.constant 4 : index
      %c0_238 = arith.constant 0 : index
      %375 = vector.load %arg3[%c1_236, %c4_237, %c0_238] : memref<4x8x128xf32, #tpu.memory_space<vmem>>, vector<1x4x128xf32>
      %376 = vector.shape_cast %375 : vector<1x4x128xf32> to vector<4x128xf32>
      %377 = vector.broadcast %370 : vector<1x128xf32> to vector<4x128xf32>
      %378 = arith.mulf %377, %374 : vector<4x128xf32>
      %379 = arith.addf %362, %378 : vector<4x128xf32>
      %380 = vector.broadcast %372 : vector<1x128xf32> to vector<4x128xf32>
      %381 = arith.mulf %380, %376 : vector<4x128xf32>
      %382 = arith.addf %379, %381 : vector<4x128xf32>
      %383 = vector.broadcast %370 : vector<1x128xf32> to vector<4x128xf32>
      %384 = arith.mulf %383, %376 : vector<4x128xf32>
      %385 = arith.addf %368, %384 : vector<4x128xf32>
      %386 = vector.broadcast %372 : vector<1x128xf32> to vector<4x128xf32>
      %387 = arith.mulf %386, %374 : vector<4x128xf32>
      %388 = arith.subf %385, %387 : vector<4x128xf32>
      %c2_239 = arith.constant 2 : index
      %c3_240 = arith.constant 3 : index
      %c0_241 = arith.constant 0 : index
      %389 = vector.load %arg2[%c2_239, %c3_240, %c0_241] : memref<4x8x128xf32, #tpu.memory_space<vmem>>, vector<1x1x128xf32>
      %390 = vector.shape_cast %389 : vector<1x1x128xf32> to vector<1x128xf32>
      %c2_242 = arith.constant 2 : index
      %c3_243 = arith.constant 3 : index
      %c0_244 = arith.constant 0 : index
      %391 = vector.load %arg3[%c2_242, %c3_243, %c0_244] : memref<4x8x128xf32, #tpu.memory_space<vmem>>, vector<1x1x128xf32>
      %392 = vector.shape_cast %391 : vector<1x1x128xf32> to vector<1x128xf32>
      %c2_245 = arith.constant 2 : index
      %c4_246 = arith.constant 4 : index
      %c0_247 = arith.constant 0 : index
      %393 = vector.load %arg2[%c2_245, %c4_246, %c0_247] : memref<4x8x128xf32, #tpu.memory_space<vmem>>, vector<1x4x128xf32>
      %394 = vector.shape_cast %393 : vector<1x4x128xf32> to vector<4x128xf32>
      %c2_248 = arith.constant 2 : index
      %c4_249 = arith.constant 4 : index
      %c0_250 = arith.constant 0 : index
      %395 = vector.load %arg3[%c2_248, %c4_249, %c0_250] : memref<4x8x128xf32, #tpu.memory_space<vmem>>, vector<1x4x128xf32>
      %396 = vector.shape_cast %395 : vector<1x4x128xf32> to vector<4x128xf32>
      %397 = vector.broadcast %390 : vector<1x128xf32> to vector<4x128xf32>
      %398 = arith.mulf %397, %394 : vector<4x128xf32>
      %399 = arith.addf %382, %398 : vector<4x128xf32>
      %400 = vector.broadcast %392 : vector<1x128xf32> to vector<4x128xf32>
      %401 = arith.mulf %400, %396 : vector<4x128xf32>
      %402 = arith.addf %399, %401 : vector<4x128xf32>
      %403 = vector.broadcast %390 : vector<1x128xf32> to vector<4x128xf32>
      %404 = arith.mulf %403, %396 : vector<4x128xf32>
      %405 = arith.addf %388, %404 : vector<4x128xf32>
      %406 = vector.broadcast %392 : vector<1x128xf32> to vector<4x128xf32>
      %407 = arith.mulf %406, %394 : vector<4x128xf32>
      %408 = arith.subf %405, %407 : vector<4x128xf32>
      %c3_251 = arith.constant 3 : index
      %c3_252 = arith.constant 3 : index
      %c0_253 = arith.constant 0 : index
      %409 = vector.load %arg2[%c3_251, %c3_252, %c0_253] : memref<4x8x128xf32, #tpu.memory_space<vmem>>, vector<1x1x128xf32>
      %410 = vector.shape_cast %409 : vector<1x1x128xf32> to vector<1x128xf32>
      %c3_254 = arith.constant 3 : index
      %c3_255 = arith.constant 3 : index
      %c0_256 = arith.constant 0 : index
      %411 = vector.load %arg3[%c3_254, %c3_255, %c0_256] : memref<4x8x128xf32, #tpu.memory_space<vmem>>, vector<1x1x128xf32>
      %412 = vector.shape_cast %411 : vector<1x1x128xf32> to vector<1x128xf32>
      %c3_257 = arith.constant 3 : index
      %c4_258 = arith.constant 4 : index
      %c0_259 = arith.constant 0 : index
      %413 = vector.load %arg2[%c3_257, %c4_258, %c0_259] : memref<4x8x128xf32, #tpu.memory_space<vmem>>, vector<1x4x128xf32>
      %414 = vector.shape_cast %413 : vector<1x4x128xf32> to vector<4x128xf32>
      %c3_260 = arith.constant 3 : index
      %c4_261 = arith.constant 4 : index
      %c0_262 = arith.constant 0 : index
      %415 = vector.load %arg3[%c3_260, %c4_261, %c0_262] : memref<4x8x128xf32, #tpu.memory_space<vmem>>, vector<1x4x128xf32>
      %416 = vector.shape_cast %415 : vector<1x4x128xf32> to vector<4x128xf32>
      %417 = vector.broadcast %410 : vector<1x128xf32> to vector<4x128xf32>
      %418 = arith.mulf %417, %414 : vector<4x128xf32>
      %419 = arith.addf %402, %418 : vector<4x128xf32>
      %420 = vector.broadcast %412 : vector<1x128xf32> to vector<4x128xf32>
      %421 = arith.mulf %420, %416 : vector<4x128xf32>
      %422 = arith.addf %419, %421 : vector<4x128xf32>
      %423 = vector.broadcast %410 : vector<1x128xf32> to vector<4x128xf32>
      %424 = arith.mulf %423, %416 : vector<4x128xf32>
      %425 = arith.addf %408, %424 : vector<4x128xf32>
      %426 = vector.broadcast %412 : vector<1x128xf32> to vector<4x128xf32>
      %427 = arith.mulf %426, %414 : vector<4x128xf32>
      %428 = arith.subf %425, %427 : vector<4x128xf32>
      %cst_263 = arith.constant 2.000000e+00 : f32
      %429 = vector.broadcast %cst_263 : f32 to vector<4x128xf32>
      %430 = arith.mulf %429, %422 : vector<4x128xf32>
      %c3_264 = arith.constant 3 : index
      %c0_265 = arith.constant 0 : index
      %c0_266 = arith.constant 0 : index
      %431 = vector.load %arg8[%c3_264, %c0_265, %c0_266] : memref<4x4x128xf32, #tpu.memory_space<vmem>>, vector<1x4x128xf32>
      %432 = vector.shape_cast %431 : vector<1x4x128xf32> to vector<4x128xf32>
      %433 = vector.shape_cast %430 : vector<4x128xf32> to vector<1x4x128xf32>
      tpu.vector_store %arg8[%c3_264, %c0_265, %c0_266], %433 {strides = array<i32>} : memref<4x4x128xf32, #tpu.memory_space<vmem>>, vector<1x4x128xf32>,
      %cst_267 = arith.constant 2.000000e+00 : f32
      %434 = vector.broadcast %cst_267 : f32 to vector<4x128xf32>
      %435 = arith.mulf %434, %428 : vector<4x128xf32>
      %c3_268 = arith.constant 3 : index
      %c0_269 = arith.constant 0 : index
      %c0_270 = arith.constant 0 : index
      %436 = vector.load %arg9[%c3_268, %c0_269, %c0_270] : memref<4x4x128xf32, #tpu.memory_space<vmem>>, vector<1x4x128xf32>
      %437 = vector.shape_cast %436 : vector<1x4x128xf32> to vector<4x128xf32>
      %438 = vector.shape_cast %435 : vector<4x128xf32> to vector<1x4x128xf32>
      tpu.vector_store %arg9[%c3_268, %c0_269, %c0_270], %438 {strides = array<i32>} : memref<4x4x128xf32, #tpu.memory_space<vmem>>, vector<1x4x128xf32>,
    } else {
    }
    %c0 = arith.constant 0 : index
    %c0_1 = arith.constant 0 : index
    %c0_2 = arith.constant 0 : index
    %3 = vector.load %arg4[%c0, %c0_1, %c0_2] : memref<1x4x128xf32, #tpu.memory_space<vmem>>, vector<1x4x128xf32>
    %4 = vector.shape_cast %3 : vector<1x4x128xf32> to vector<4x128xf32>
    %c0_3 = arith.constant 0 : index
    %c0_4 = arith.constant 0 : index
    %c0_5 = arith.constant 0 : index
    %5 = vector.load %arg5[%c0_3, %c0_4, %c0_5] : memref<1x4x128xf32, #tpu.memory_space<vmem>>, vector<1x4x128xf32>
    %6 = vector.shape_cast %5 : vector<1x4x128xf32> to vector<4x128xf32>
    %c0_6 = arith.constant 0 : index
    %c0_7 = arith.constant 0 : index
    %c0_8 = arith.constant 0 : index
    %7 = vector.load %arg8[%c0_6, %c0_7, %c0_8] : memref<4x4x128xf32, #tpu.memory_space<vmem>>, vector<1x4x128xf32>
    %8 = vector.shape_cast %7 : vector<1x4x128xf32> to vector<4x128xf32>
    %c0_9 = arith.constant 0 : index
    %c0_10 = arith.constant 0 : index
    %c0_11 = arith.constant 0 : index
    %9 = vector.load %arg9[%c0_9, %c0_10, %c0_11] : memref<4x4x128xf32, #tpu.memory_space<vmem>>, vector<1x4x128xf32>
    %10 = vector.shape_cast %9 : vector<1x4x128xf32> to vector<4x128xf32>
    %11 = arith.mulf %8, %4 : vector<4x128xf32>
    %12 = arith.mulf %10, %6 : vector<4x128xf32>
    %13 = arith.subf %11, %12 : vector<4x128xf32>
    %cst = arith.constant dense<0.000000e+00> : vector<128xf32>
    %14 = vector.multi_reduction <add>, %13, %cst [0] : vector<4x128xf32> to vector<128xf32>
    %15 = vector.shape_cast %14 : vector<128xf32> to vector<1x128xf32>
    %16 = arith.mulf %8, %6 : vector<4x128xf32>
    %17 = arith.mulf %10, %4 : vector<4x128xf32>
    %18 = arith.addf %16, %17 : vector<4x128xf32>
    %cst_12 = arith.constant dense<0.000000e+00> : vector<128xf32>
    %19 = vector.multi_reduction <add>, %18, %cst_12 [0] : vector<4x128xf32> to vector<128xf32>
    %20 = vector.shape_cast %19 : vector<128xf32> to vector<1x128xf32>
    %c1 = arith.constant 1 : index
    %c0_13 = arith.constant 0 : index
    %c0_14 = arith.constant 0 : index
    %21 = vector.load %arg8[%c1, %c0_13, %c0_14] : memref<4x4x128xf32, #tpu.memory_space<vmem>>, vector<1x4x128xf32>
    %22 = vector.shape_cast %21 : vector<1x4x128xf32> to vector<4x128xf32>
    %c1_15 = arith.constant 1 : index
    %c0_16 = arith.constant 0 : index
    %c0_17 = arith.constant 0 : index
    %23 = vector.load %arg9[%c1_15, %c0_16, %c0_17] : memref<4x4x128xf32, #tpu.memory_space<vmem>>, vector<1x4x128xf32>
    %24 = vector.shape_cast %23 : vector<1x4x128xf32> to vector<4x128xf32>
    %25 = arith.mulf %22, %4 : vector<4x128xf32>
    %26 = arith.mulf %24, %6 : vector<4x128xf32>
    %27 = arith.subf %25, %26 : vector<4x128xf32>
    %cst_18 = arith.constant dense<0.000000e+00> : vector<128xf32>
    %28 = vector.multi_reduction <add>, %27, %cst_18 [0] : vector<4x128xf32> to vector<128xf32>
    %29 = vector.shape_cast %28 : vector<128xf32> to vector<1x128xf32>
    %30 = arith.mulf %22, %6 : vector<4x128xf32>
    %31 = arith.mulf %24, %4 : vector<4x128xf32>
    %32 = arith.addf %30, %31 : vector<4x128xf32>
    %cst_19 = arith.constant dense<0.000000e+00> : vector<128xf32>
    %33 = vector.multi_reduction <add>, %32, %cst_19 [0] : vector<4x128xf32> to vector<128xf32>
    %34 = vector.shape_cast %33 : vector<128xf32> to vector<1x128xf32>
    %c2 = arith.constant 2 : index
    %c0_20 = arith.constant 0 : index
    %c0_21 = arith.constant 0 : index
    %35 = vector.load %arg8[%c2, %c0_20, %c0_21] : memref<4x4x128xf32, #tpu.memory_space<vmem>>, vector<1x4x128xf32>
    %36 = vector.shape_cast %35 : vector<1x4x128xf32> to vector<4x128xf32>
    %c2_22 = arith.constant 2 : index
    %c0_23 = arith.constant 0 : index
    %c0_24 = arith.constant 0 : index
    %37 = vector.load %arg9[%c2_22, %c0_23, %c0_24] : memref<4x4x128xf32, #tpu.memory_space<vmem>>, vector<1x4x128xf32>
    %38 = vector.shape_cast %37 : vector<1x4x128xf32> to vector<4x128xf32>
    %39 = arith.mulf %36, %4 : vector<4x128xf32>
    %40 = arith.mulf %38, %6 : vector<4x128xf32>
    %41 = arith.subf %39, %40 : vector<4x128xf32>
    %cst_25 = arith.constant dense<0.000000e+00> : vector<128xf32>
    %42 = vector.multi_reduction <add>, %41, %cst_25 [0] : vector<4x128xf32> to vector<128xf32>
    %43 = vector.shape_cast %42 : vector<128xf32> to vector<1x128xf32>
    %44 = arith.mulf %36, %6 : vector<4x128xf32>
    %45 = arith.mulf %38, %4 : vector<4x128xf32>
    %46 = arith.addf %44, %45 : vector<4x128xf32>
    %cst_26 = arith.constant dense<0.000000e+00> : vector<128xf32>
    %47 = vector.multi_reduction <add>, %46, %cst_26 [0] : vector<4x128xf32> to vector<128xf32>
    %48 = vector.shape_cast %47 : vector<128xf32> to vector<1x128xf32>
    %c3 = arith.constant 3 : index
    %c0_27 = arith.constant 0 : index
    %c0_28 = arith.constant 0 : index
    %49 = vector.load %arg8[%c3, %c0_27, %c0_28] : memref<4x4x128xf32, #tpu.memory_space<vmem>>, vector<1x4x128xf32>
    %50 = vector.shape_cast %49 : vector<1x4x128xf32> to vector<4x128xf32>
    %c3_29 = arith.constant 3 : index
    %c0_30 = arith.constant 0 : index
    %c0_31 = arith.constant 0 : index
    %51 = vector.load %arg9[%c3_29, %c0_30, %c0_31] : memref<4x4x128xf32, #tpu.memory_space<vmem>>, vector<1x4x128xf32>
    %52 = vector.shape_cast %51 : vector<1x4x128xf32> to vector<4x128xf32>
    %53 = arith.mulf %50, %4 : vector<4x128xf32>
    %54 = arith.mulf %52, %6 : vector<4x128xf32>
    %55 = arith.subf %53, %54 : vector<4x128xf32>
    %cst_32 = arith.constant dense<0.000000e+00> : vector<128xf32>
    %56 = vector.multi_reduction <add>, %55, %cst_32 [0] : vector<4x128xf32> to vector<128xf32>
    %57 = vector.shape_cast %56 : vector<128xf32> to vector<1x128xf32>
    %58 = arith.mulf %50, %6 : vector<4x128xf32>
    %59 = arith.mulf %52, %4 : vector<4x128xf32>
    %60 = arith.addf %58, %59 : vector<4x128xf32>
    %cst_33 = arith.constant dense<0.000000e+00> : vector<128xf32>
    %61 = vector.multi_reduction <add>, %60, %cst_33 [0] : vector<4x128xf32> to vector<128xf32>
    %62 = vector.shape_cast %61 : vector<128xf32> to vector<1x128xf32>
    %63 = tpu.concatenate %15, %29, %43, %57 in 0 : vector<1x128xf32>, vector<1x128xf32>, vector<1x128xf32>, vector<1x128xf32> -> vector<4x128xf32>
    %c0_34 = arith.constant 0 : index
    %c0_35 = arith.constant 0 : index
    %c0_36 = arith.constant 0 : index
    %64 = vector.load %arg6[%c0_34, %c0_35, %c0_36] : memref<1x4x128xf32, #tpu.memory_space<vmem>>, vector<1x4x128xf32>
    %65 = vector.shape_cast %64 : vector<1x4x128xf32> to vector<4x128xf32>
    %66 = vector.shape_cast %63 : vector<4x128xf32> to vector<1x4x128xf32>
    tpu.vector_store %arg6[%c0_34, %c0_35, %c0_36], %66 {strides = array<i32>} : memref<1x4x128xf32, #tpu.memory_space<vmem>>, vector<1x4x128xf32>,
    %67 = tpu.concatenate %20, %34, %48, %62 in 0 : vector<1x128xf32>, vector<1x128xf32>, vector<1x128xf32>, vector<1x128xf32> -> vector<4x128xf32>
    %c0_37 = arith.constant 0 : index
    %c0_38 = arith.constant 0 : index
    %c0_39 = arith.constant 0 : index
    %68 = vector.load %arg7[%c0_37, %c0_38, %c0_39] : memref<1x4x128xf32, #tpu.memory_space<vmem>>, vector<1x4x128xf32>
    %69 = vector.shape_cast %68 : vector<1x4x128xf32> to vector<4x128xf32>
    %70 = vector.shape_cast %67 : vector<4x128xf32> to vector<1x4x128xf32>
    tpu.vector_store %arg7[%c0_37, %c0_38, %c0_39], %70 {strides = array<i32>} : memref<1x4x128xf32, #tpu.memory_space<vmem>>, vector<1x4x128xf32>,
    return
  }
  func.func @transform_0(%arg0: i32, %arg1: i32) -> (i32, i32, i32) {
    %c0_i32 = arith.constant 0 : i32
    %c0_i32_0 = arith.constant 0 : i32
    %c0_i32_1 = arith.constant 0 : i32
    return %c0_i32, %c0_i32_0, %arg0 : i32, i32, i32
  }
  func.func @transform_1(%arg0: i32, %arg1: i32) -> (i32, i32, i32) {
    %c0_i32 = arith.constant 0 : i32
    %c0_i32_0 = arith.constant 0 : i32
    %c0_i32_1 = arith.constant 0 : i32
    return %c0_i32, %c0_i32_0, %arg0 : i32, i32, i32
  }
  func.func @transform_2(%arg0: i32, %arg1: i32) -> (i32, i32, i32) {
    %c0_i32 = arith.constant 0 : i32
    %c0_i32_0 = arith.constant 0 : i32
    return %arg1, %c0_i32, %arg0 : i32, i32, i32
  }
  func.func @transform_3(%arg0: i32, %arg1: i32) -> (i32, i32, i32) {
    %c0_i32 = arith.constant 0 : i32
    %c0_i32_0 = arith.constant 0 : i32
    return %arg1, %c0_i32, %arg0 : i32, i32, i32
  }
  func.func @transform_4(%arg0: i32, %arg1: i32) -> (i32, i32, i32) {
    %c0_i32 = arith.constant 0 : i32
    %c0_i32_0 = arith.constant 0 : i32
    return %arg1, %c0_i32, %arg0 : i32, i32, i32
  }
  func.func @transform_5(%arg0: i32, %arg1: i32) -> (i32, i32, i32) {
    %c0_i32 = arith.constant 0 : i32
    %c0_i32_0 = arith.constant 0 : i32
    return %arg1, %c0_i32, %arg0 : i32, i32, i32
  }
}

</mosaic_0001>

<bundles_post_ra>
// kernel: tpu_custom_call.1
= control target key start
LH: loop header
LB: loop body
LE: loop exit
PB: predicated region body
PF: predicated region fallthrough
CT: control target
= control target key end

     0   :  { %s2165_s0 = inlined_call_operand.hbm [shape: f32[4,8,256], index: 0, kind: input, shape index: {}]   ;;  %s2166_s1 = inlined_call_operand.hbm [shape: f32[4,8,256], index: 1, kind: input, shape index: {}]   ;;  %s2167_s2 = inlined_call_operand.hbm [shape: f32[2,4,256], index: 2, kind: input, shape index: {}]   ;;  %s2168_s3 = inlined_call_operand.hbm [shape: f32[2,4,256], index: 3, kind: input, shape index: {}]   ;;  %s2169_s4 = inlined_call_operand.hbm [shape: f32[2,4,256], index: 4, kind: output, shape index: {0}]   ;;  %s2170_s5 = inlined_call_operand.hbm [shape: f32[2,4,256], index: 5, kind: output, shape index: {1}]  }
   0x1   :  { %2189 = sst [smem:[#allocation27_spill]] %s2165_s0 }
   0x2   :  { %2190 = sst [smem:[#allocation28_spill]] %s2166_s1 }
   0x3   :  { %2191 = sst [smem:[#allocation29_spill]] %s2169_s4 }
   0x4   :  { %2192 = sst [smem:[#allocation30_spill]] %s2170_s5 }
   0x5   :  { %11 = vsyncpa [#allocation5], 0 }
   0x6   :  { %13 = vsyncpa [#allocation5 + $0x1], 0 }
   0x7   :  { %14 = vsyncpa [#allocation8], 0 }
   0x8   :  { %16 = vsyncpa [#allocation8 + $0x1], 0 }
   0x9   :  { %17 = vsyncpa [#allocation11], 0 }
   0xa   :  { %19 = vsyncpa [#allocation11 + $0x1], 0 }
   0xb   :  { %20 = vsyncpa [#allocation6], 0 }
   0xc   :  { %22 = vsyncpa [#allocation6 + $0x1], 0 }
   0xd   :  { %23 = vsyncpa [#allocation14], 0 }
   0xe   :  { %25 = vsyncpa [#allocation14 + $0x1], 0  ;;  %s1632_s18 = smov 0   ;;  %s1634_s19 = smov 0  }
   0xf   :  { %s1636_s20 = smov 0   ;;  %s1638_s21 = smov 0  }
  0x10   :  { %s1640_s22 = smov 0   ;;  %s1642_s23 = smov 0  }
  0x11   :  { %s1644_s24 = smov 0   ;;  %s1646_s25 = smov 0  }
  0x12   :  { %s1648_s26 = smov 0   ;;  %s1650_s27 = smov 0  }
  0x13   :  { %s1652_s28 = smov 0  }
  0x14 LB: > { %2193 = sst [smem:[#allocation21_spill]] %s1575_s24  ;;  %p57_p0 = scmp.ne.s32.totalorder %s1571_s23, %s1567_s22  ;;  %s1591_s28 = sphi %s1652_s28, %s31_s28   ;;  %s1587_s27 = sphi %s1650_s27, %s2241_s27   ;;  %s1583_s26 = sphi %s1648_s26, %s2240_s26   ;;  %s1579_s25 = sphi %s1646_s25, %s2239_s25   ;;  %s1575_s24 = sphi %s1644_s24, %s2238_s24   ;;  %s1571_s23 = sphi %s1642_s23, %s2237_s23   ;;  %s1567_s22 = sphi %s1640_s22, %s2236_s22   ;;  %s1563_s21 = sphi %s1638_s21, %s2235_s21   ;;  %s1559_s20 = sphi %s1636_s20, %s2234_s20   ;;  %s1555_s19 = sphi %s1634_s19, %s2233_s19   ;;  %s1551_s18 = sphi %s1632_s18, %s2232_s18  }
  0x15   : > { %2194 = sst [smem:[#allocation22_spill]] %s1579_s25  ;;  %p2172_p1 = scmp.eq.s32.totalorder %s1591_s28, 0 }
  0x16   : > { %p2171_p4 = scmp.lt.s32.totalorder %s1591_s28, 4  ;;  %s2173_s29 = sand.u32 1, %s1571_s23  }
  0x17   : > { %p59_p3 = por %p2172_p1, %p57_p0  ;;  %s1075_s30 = sshll.u32 %s1587_s27, 7 }
  0x18   : > { %s1699_s6 = sshll.u32 %s2173_s29, 5  ;;  %s245_s8 = sand.u32 1, %s1591_s28  }
  0x19   : > { %p1703_p5 = pnand %p2171_p4, %p59_p3  ;;  %s2196_s1 = sld [smem:[#allocation28_spill]] }
  0x1a   : > { %s249_s12 = scalar_lea.vmem [#allocation7], %s1699_s6  ;;  %p303_p7 = scmp.lt.s32.totalorder %s1591_s28, 5 }
  0x1b   : > { %s255_s13 = sshll.u32 %s249_s12, 4  ;;  %s1720_s14 = scalar_lea.sflag [#allocation8], %s245_s8  ;;  %s1717_s13 = int_to_ptr.vmem [resolvable:$true] %s255_s13 }
  0x1c   : > { %p1307_p9 = pneg %p1703_p5 }
  0x1f   : > { %s1713_s11 = scalar_lea.hbm %s2196_s1, %s1075_s30  ;;  %s1310_s9 = scalar_lea.hbm %s2196_s1, 1024 }
  0x20   : > { %s1305_s15 = scalar_lea.hbm %s1713_s11, 512  ;;  %p1311_p12 = scmp.lt.u32.totalorder %s1713_s11, %s2196_s1 }
  0x21   : > { %p1306_p8 = scmp.ne.s32.totalorder %s1713_s11, %s1305_s15  ;;  %p1312_p13 = scmp.lt.u32.totalorder %s1310_s9, %s1305_s15 }
  0x22   : > { %p1314_p3 = scmp.lt.u32.totalorder %s1305_s15, %s1713_s11 }
  0x23   : > { %p1308_p10 = pnand %p1307_p9, %p1306_p8  ;;  %p1313_p0 = por %p1312_p13, %p1311_p12 }
  0x25   : > { %p1309_p11 = pneg %p1308_p10  ;;  %p1315_p4 = por %p1314_p3, %p1313_p0 }
  0x27   : > { %p1316_p1 = pnand %p1315_p4, %p1309_p11 }
  0x29   : > { %1319 = shalt.err (!%p1316_p1)
}
  0x2a   : > { %s1320_s8 = scalar_lea.vmem %s1717_s13, 512  ;;  %s1593_s16 = smov [#allocation7]  }
  0x2b   : > { %p1321_p8 = scmp.ne.s32.totalorder %s1717_s13, %s1320_s8  ;;  %s1325_s17 = sshll.u32 %s1593_s16, 4  ;;  %s1326_s17 = int_to_ptr.vmem [resolvable:$false] %s1325_s17 }
  0x2c   : > { %s1327_s10 = scalar_lea.vmem %s1326_s17, 1024  ;;  %p1328_p6 = scmp.lt.s32.totalorder %s1717_s13, %s1326_s17 }
  0x2d   : > { %p1323_p10 = pnand %p1321_p8, %p1307_p9  ;;  %p1329_p12 = scmp.lt.s32.totalorder %s1327_s10, %s1320_s8 }
  0x2f   : > { %p1324_p2 = pneg %p1323_p10  ;;  %p1330_p13 = por %p1329_p12, %p1328_p6 }
  0x31   : > { %p1331_p0 = pnand %p1330_p13, %p1324_p2 }
  0x33   : > { %1334 = shalt.err (!%p1331_p0)
}
  0x34   : > { %s2174_s15 = smov 256   ;;  %s2175_s9 = smov 128  }
  0x35   : > { %s2176_s12 = smov 8   ;;  %p2197_p1 = scmp.ge.s32.totalorder %s1591_s28, 1 }
  0x36   : > { %1198 = dma.hbm_to_vmem [thread:$0]  (!%p1703_p5), %s1713_s11, 512, %s1717_s13, %s1720_s14, %s2174_s15, %s2175_s9, %s2176_s12  }
  0x37   : > { %p1755_p2 = pnand %p2197_p1, %p303_p7  ;;  %s2199_s0 = sld [smem:[#allocation27_spill]] }
  0x38   : > { %s229_s29 = scalar_lea.vmem [#allocation4], %s1699_s6  ;;  %s2200_s11 = sand.u32 1, %s1571_s23  }
  0x39   : > { %s2198_s8 = scalar_select %p1755_p2, 1, 0 }
  0x3a   : > { %s235_s1 = sshll.u32 %s229_s29, 4  ;;  %s1771_s13 = scalar_lea.sflag [#allocation5], %s2200_s11  ;;  %s1767_s1 = int_to_ptr.vmem [resolvable:$true] %s235_s1 }
  0x3d   : > { %s1764_s10 = scalar_lea.hbm %s2199_s0, %s1075_s30  ;;  %s1340_s17 = scalar_lea.hbm %s2199_s0, 1024 }
  0x3e   : > { %s1335_s15 = scalar_lea.hbm %s1764_s10, 512  ;;  %p1341_p11 = scmp.lt.u32.totalorder %s1764_s10, %s2199_s0 }
  0x3f   : > { %p1336_p4 = scmp.ne.s32.totalorder %s1764_s10, %s1335_s15  ;;  %p1342_p3 = scmp.lt.u32.totalorder %s1340_s17, %s1335_s15 }
  0x40   : > { %p1344_p10 = scmp.lt.u32.totalorder %s1335_s15, %s1764_s10 }
  0x41   : > { %p1338_p6 = pnand %p1336_p4, %p1307_p9  ;;  %p1343_p8 = por %p1342_p3, %p1341_p11 }
  0x43   : > { %p1339_p7 = pneg %p1338_p6  ;;  %p1345_p12 = por %p1344_p10, %p1343_p8 }
  0x45   : > { %p1346_p13 = pnand %p1345_p12, %p1339_p7 }
  0x47   : > { %1349 = shalt.err (!%p1346_p13)
}
  0x48   : > { %s1350_s29 = scalar_lea.vmem %s1767_s1, 512  ;;  %s1597_s6 = smov [#allocation4]  }
  0x49   : > { %p1351_p0 = scmp.ne.s32.totalorder %s1767_s1, %s1350_s29  ;;  %s1355_s11 = sshll.u32 %s1597_s6, 4  ;;  %s1356_s11 = int_to_ptr.vmem [resolvable:$false] %s1355_s11 }
  0x4a   : > { %s1357_s9 = scalar_lea.vmem %s1356_s11, 1024  ;;  %p1358_p6 = scmp.lt.s32.totalorder %s1767_s1, %s1356_s11 }
  0x4b   : > { %p1353_p1 = pnand %p1351_p0, %p1307_p9  ;;  %p1359_p11 = scmp.lt.s32.totalorder %s1357_s9, %s1350_s29 }
  0x4d   : > { %p1354_p4 = pneg %p1353_p1  ;;  %p1360_p3 = por %p1359_p11, %p1358_p6 }
  0x4f   : > { %p1361_p8 = pnand %p1360_p3, %p1354_p4 }
  0x51   : > { %1364 = shalt.err (!%p1361_p8)
}
  0x52   : > { %s2201_s15 = smov 8   ;;  %s2202_s12 = smov 128  }
  0x53   : > { %s2203_s16 = smov 256   ;;  %s1801_s7 = sadd.s32 4294967295, %s1591_s28  }
  0x54   : > { %1195 = dma.hbm_to_vmem [thread:$0]  (!%p1703_p5), %s1764_s10, 512, %s1767_s1, %s1771_s13, %s2203_s16, %s2202_s12, %s2201_s15  }
  0x55   : > { %s1071_s30 = sadd.s32 4294967294, %s1591_s28   ;;  %s40_s17 = sadd.s32 1, %s1583_s26 }
  0x56   : > { %s43_s29 = sadd.s32 1, %s1587_s27  ;;  %p41_p9 = scmp.ge.s32.totalorder %s40_s17, 2 }
  0x57   : > { %s50_s6 = sadd.s32 1, %s1571_s23  ;;  %p64_p7 = scmp.eq.s32.totalorder %s1801_s7, 0 }
  0x58   : > { %s104_s11 = sadd.s32 1, %s1559_s20  ;;  %s2243_s17 = smov (%p41_p9, %s40_s17), 0 }
  0x59   : > { %2204 = sst [smem:[#allocation23_spill]] %s2243_s17  ;;  %s2245_s29 = smov (!%p41_p9, %s43_s29), %s1587_s27 }
  0x5a   : > { %p2205_p5 = scmp.ne.s32.totalorder %s1567_s22, %s1563_s21  ;;  %s99_s10 = ssub.s32 %s1583_s26, %s2243_s17 }
  0x5b   : > { %p45_p12 = scmp.ge.s32.totalorder %s2245_s29, 2  ;;  %p111_p13 = scmp.ne.s32.totalorder %s1559_s20, %s1555_s19 }
  0x5c   : > { %p1815_p10 = por %p64_p7, %p2205_p5  ;;  %p117_p0 = scmp.ne.s32.totalorder %s1555_s19, %s1551_s18 }
  0x5d   : > { %p171_p1 = scmp.eq.s32.totalorder %s1801_s7, 3  ;;  %s2247_s29 = smov (%p45_p12, %s2245_s29), 0 }
  0x5e   : > { %s2206_s1 = scalar_select %p1815_p10, 1, 0 }
  0x5f   : > { %2207 = sst [smem:[#allocation24_spill]] %s2247_s29  ;;  %p2208_p4 = scmp.eq.s32.totalorder %s1591_s28, 0 }
  0x60   : > { %p1837_p11 = por %p117_p0, %p64_p7  ;;  %s47_s9 = ssub.s32 %s1587_s27, %s2247_s29 }
  0x61   : > { %p1830_p6 = por %p111_p13, %p2208_p4  ;;  %p1843_p3 = por %p171_p1, %p111_p13 }
  0x62   : > { %s2210_s13 = scalar_select %p1837_p11, 1, 0 }
  0x63   : > { %s2212_s15 = scalar_select %p1843_p3, 1, 0 }
  0x64   : > { %2211 = sst [smem:[#allocation25_spill]] %s2210_s13  ;;  %p48_p8 = scmp.eq.s32.totalorder %s47_s9, 0 }
  0x65   : > { %2213 = sst [smem:[#allocation26_spill]] %s2212_s15  ;;  %s101_s12 = sor.u32 %s99_s10, %s47_s9 }
  0x66   : > { %p102_p9 = scmp.eq.s32.totalorder %s101_s12, 0  ;;  %p177_p5 = scmp.eq.s32.totalorder %s1071_s30, 3 }
  0x67   : > { %s1848_s16 = scalar_select %p48_p8, %s1571_s23, %s50_s6  }
  0x68   : > { %s1851_s0 = scalar_select %p102_p9, %s1559_s20, %s104_s11  }
  0x69   : > { %p1856_p7 = por %p177_p5, %p117_p0  ;;  %s2185_s29 = sand.u32 1, %s1559_s20  }
  0x6a   : > { %s1078_s5 = sshll.u32 %s2185_s29, 2  ;;  %s1079_s4 = sshll.u32 %s1583_s26, 1 }
  0x6b   : > { %s2214_s17 = scalar_select %p1856_p7, 1, 0 }
  0x6c   : > { %s274_s15 = sadd.s32 %s1587_s27, %s1079_s4  ;;  %s269_s24 = scalar_lea.vmem [#allocation9], %s1078_s5 }
  0x6d   : > { %s1080_s25 = sshll.u32 %s274_s15, 6  ;;  %s278_s13 = sshll.u32 %s269_s24, 4  ;;  %s1870_s13 = int_to_ptr.vmem [resolvable:$true] %s278_s13 }
  0x6e   : > { %s1868_s30 = scalar_lea.hbm %s2167_s2, %s1080_s25  ;;  %p2215_p12 = scmp.lt.s32.totalorder %s1591_s28, 4 }
  0x6f   : > { %s1883_s24 = scalar_lea.hbm %s2168_s3, %s1080_s25  ;;  %s289_s15 = scalar_lea.vmem [#allocation10], %s1078_s5 }
  0x70   : > { %p1876_p13 = pnand %p2215_p12, %p1830_p6  ;;  %s1885_s12 = sshll.u32 %s289_s15, 4  ;;  %s299_s12 = int_to_ptr.vmem [resolvable:$true] %s1885_s12 }
  0x71   : > { %s1365_s10 = scalar_lea.hbm %s1868_s30, 64  ;;  %s1370_s29 = scalar_lea.hbm %s2167_s2, 256 }
  0x72   : > { %p1366_p0 = scmp.ne.s32.totalorder %s1868_s30, %s1365_s10  ;;  %p1367_p1 = pneg %p1876_p13 }
  0x73   : > { %p1371_p8 = scmp.lt.u32.totalorder %s1868_s30, %s2167_s2  ;;  %p1372_p9 = scmp.lt.u32.totalorder %s1370_s29, %s1365_s10 }
  0x74   : > { %p1368_p4 = pnand %p1367_p1, %p1366_p0  ;;  %p1374_p12 = scmp.lt.u32.totalorder %s1365_s10, %s1868_s30 }
  0x75   : > { %p1373_p5 = por %p1372_p9, %p1371_p8 }
  0x76   : > { %p1369_p6 = pneg %p1368_p4 }
  0x77   : > { %p1375_p7 = por %p1374_p12, %p1373_p5 }
  0x79   : > { %p1376_p3 = pnand %p1375_p7, %p1369_p6 }
  0x7b   : > { %1379 = shalt.err (!%p1376_p3)
}
  0x7c   : > { %s1380_s5 = scalar_lea.vmem %s1870_s13, 64  ;;  %s1598_s25 = smov [#allocation9]  }
  0x7d   : > { %p1381_p0 = scmp.ne.s32.totalorder %s1870_s13, %s1380_s5  ;;  %s1385_s15 = sshll.u32 %s1598_s25, 4  ;;  %s1386_s15 = int_to_ptr.vmem [resolvable:$false] %s1385_s15 }
  0x7e   : > { %s1387_s21 = scalar_lea.vmem %s1386_s15, 128  ;;  %p1388_p10 = scmp.lt.s32.totalorder %s1870_s13, %s1386_s15 }
  0x7f   : > { %p1383_p4 = pnand %p1381_p0, %p1367_p1  ;;  %p1389_p8 = scmp.lt.s32.totalorder %s1387_s21, %s1380_s5 }
  0x81   : > { %p1384_p11 = pneg %p1383_p4  ;;  %p1390_p9 = por %p1389_p8, %p1388_p10 }
  0x83   : > { %p1391_p5 = pnand %p1390_p9, %p1384_p11 }
  0x85   : > { %1394 = shalt.err (!%p1391_p5)
}
  0x86   : > { %1201 = dma.hbm_to_vmem [thread:$0]  (!%p1876_p13), %s1868_s30, 64, %s1870_s13, %s1720_s14  }
  0x87   : > { %s2217_s29 = sand.u32 1, %s1559_s20   ;;  %s1395_s9 = scalar_lea.hbm %s1883_s24, 64 }
  0x88   : > { %s286_s10 = scalar_lea.sflag [#allocation11], %s2217_s29  ;;  %p1396_p10 = scmp.ne.s32.totalorder %s1883_s24, %s1395_s9 }
  0x89   : > { %s1400_s5 = scalar_lea.hbm %s2168_s3, 256  ;;  %p1401_p7 = scmp.lt.u32.totalorder %s1883_s24, %s2168_s3 }
  0x8a   : > { %p1398_p11 = pnand %p1396_p10, %p1367_p1  ;;  %p1402_p6 = scmp.lt.u32.totalorder %s1400_s5, %s1395_s9 }
  0x8b   : > { %p1404_p0 = scmp.lt.u32.totalorder %s1395_s9, %s1883_s24 }
  0x8c   : > { %p1399_p3 = pneg %p1398_p11  ;;  %p1403_p12 = por %p1402_p6, %p1401_p7 }
  0x8e   : > { %p1405_p4 = por %p1404_p0, %p1403_p12 }
  0x90   : > { %p1406_p8 = pnand %p1405_p4, %p1399_p3 }
  0x92   : > { %1409 = shalt.err (!%p1406_p8)
}
  0x93   : > { %s1410_s14 = scalar_lea.vmem %s299_s12, 64  ;;  %s1599_s13 = smov [#allocation10]  }
  0x94   : > { %p1411_p9 = scmp.ne.s32.totalorder %s299_s12, %s1410_s14  ;;  %s1415_s30 = sshll.u32 %s1599_s13, 4  ;;  %s1416_s30 = int_to_ptr.vmem [resolvable:$false] %s1415_s30 }
  0x95   : > { %s1417_s21 = scalar_lea.vmem %s1416_s30, 128  ;;  %p1418_p11 = scmp.lt.s32.totalorder %s299_s12, %s1416_s30 }
  0x96   : > { %p1413_p5 = pnand %p1411_p9, %p1367_p1  ;;  %p1419_p2 = scmp.lt.s32.totalorder %s1417_s21, %s1410_s14 }
  0x98   : > { %p1414_p10 = pneg %p1413_p5  ;;  %p1420_p6 = por %p1419_p2, %p1418_p11 }
  0x9a   : > { %p1421_p7 = pnand %p1420_p6, %p1414_p10 }
  0x9c   : > { %1424 = shalt.err (!%p1421_p7)
}
  0x9d   : > { %1204 = dma.hbm_to_vmem [thread:$0]  (!%p1876_p13), %s1883_s24, 64, %s299_s12, %s286_s10  }
  0x9e   : > { %p2218_p3 = scmp.ne.s32.totalorder %s2198_s8, 0 }
  0x9f   : > { %s309_s29 = sand.u32 (!%p2218_p3), 1, %s1567_s22   ;;  %p2219_p1 = scmp.ne.s32.totalorder (!%p2218_p3), %s2206_s1, 0 }
  0xa0   : > { %307 = sbr.rel (%p2218_p3) target bundleno = 301 (0x12d), region = 36  ;;  %s1085_s9 = sshll.u32 (!%p2218_p3), %s309_s29, 5 }
  0xa1   : > { %s310_s4 = scalar_lea.sflag (!%p2218_p3), [#allocation5], %s309_s29  ;;  %s1938_s11 = scalar_lea.vmem (!%p2218_p3), [#allocation4], %s1085_s9 }
  0xa7   : > { %1526 = dma.done.wait (%p2219_p1), %s310_s4, 512  }
  0xa8   : > { %1528 = vsyncadd (%p2219_p1), %s310_s4, 4294966784  ;;  %s318_s6 = sand.u32 1, %s1801_s7   ;;  %s1945_s24 = scalar_lea.vmem [#allocation7], %s1085_s9 }
  0xa9   : > { %s319_s5 = scalar_lea.sflag [#allocation8], %s318_s6 }
  0xaa   : > { %1530 = dma.done.wait (%p2219_p1), %s319_s5, 512  }
  0xab   : > { %1532 = vsyncadd (%p2219_p1), %s319_s5, 4294966784  ;;  %s2220_s8 = sld [smem:[#allocation25_spill]]  ;;  %s1952_s12 = sand.u32 1, %s1555_s19  }
  0xac   : > { %s1955_s10 = sshll.u32 %s1952_s12, 2 }
  0xad   : > { %s331_s25 = scalar_lea.vmem [#allocation9], %s1955_s10 }
  0xb1   : > { %p2221_p2 = scmp.ne.s32.totalorder %s2220_s8, 0 }
  0xb3   : > { %1534 = dma.done.wait (%p2221_p2), %s319_s5, 64  }
  0xb4   : > { %1536 = vsyncadd (%p2221_p2), %s319_s5, 4294967232  ;;  %s337_s7 = scalar_lea.sflag [#allocation11], %s1952_s12  ;;  %s340_s1 = scalar_lea.vmem [#allocation10], %s1955_s10 }
  0xb5   : > { %1538 = dma.done.wait (%p2221_p2), %s337_s7, 64  }
  0xb6   : > { %1540 = vsyncadd (%p2221_p2), %s337_s7, 4294967232  ;;  %s379_s15 = scalar_lea.vmem [#allocation12], %s1955_s10  ;;  %s386_s14 = scalar_lea.vmem [#allocation13], %s1955_s10 }
  0xb7   : > { %s2222_s13 = sld [smem:[#allocation21_spill]] }
  0xbd   : > { %p1091_p13 = scmp.ne.s32.totalorder %s2222_s13, 0 }
  0xbe   : > { %v1092_v0 = vld [vmem:[%s1938_s11] ss:$0 sm:$0xff] (!%p1091_p13)  ;;  %v393_v2 = vld [vmem:[%s1938_s11 + $0x4] sm:$0xf] (!%p1091_p13)  ;;  %v1098_v5 = vld [vmem:[%s1938_s11 + $0x8] ss:$0 sm:$0xff] (!%p1091_p13) }
  0xbf   : > { %390 = sbr.rel (%p1091_p13) target bundleno = 235 (0xeb), region = 56  ;;  %v1093_v1 = vld [vmem:[%s1945_s24] ss:$0 sm:$0xff] (!%p1091_p13)  ;;  %v394_v3 = vld [vmem:[%s1945_s24 + $0x4] sm:$0xf] (!%p1091_p13)  ;;  %v399_v4 = vmul.f32 (!%p1091_p13), %v1092_v0, %v393_v2 }
  0xc0   : > { %v1099_v6 = vld [vmem:[%s1945_s24 + $0x8] ss:$0 sm:$0xff] (!%p1091_p13)  ;;  %v409_v7 = vmul.f32 (!%p1091_p13), %v1093_v1, %v393_v2  ;;  %v405_v8 = vmul.f32 (!%p1091_p13), %v1093_v1, %v394_v3  ;;  %v1096_v9 = vld [vmem:[%s1938_s11 + $0xc] sm:$0xf] (!%p1091_p13)  ;;  %v1104_v11 = vld [vmem:[%s1938_s11 + $0x10] ss:$0 sm:$0xff] (!%p1091_p13)  ;;  %v407_v12 = vmul.f32 (!%p1091_p13), %v1092_v0, %v394_v3 }
  0xc1   : > { %v1097_v10 = vld [vmem:[%s1945_s24 + $0xc] sm:$0xf] (!%p1091_p13)  ;;  %v421_v13 = vmul.f32 (!%p1091_p13), %v1098_v5, %v1096_v9  ;;  %v1105_v14 = vld [vmem:[%s1945_s24 + $0x10] ss:$0 sm:$0xff] (!%p1091_p13)  ;;  %v1102_v15 = vld [vmem:[%s1938_s11 + $0x14] sm:$0xf] (!%p1091_p13)  ;;  %v431_v24 = vmul.f32 (!%p1091_p13), %v1099_v6, %v1096_v9 }
  0xc2   : > { %v1103_v16 = vld [vmem:[%s1945_s24 + $0x14] sm:$0xf] (!%p1091_p13)  ;;  %v429_v17 = vmul.f32 (!%p1091_p13), %v1098_v5, %v1097_v10  ;;  %v406_v18 = vadd.f32 (!%p1091_p13), %v405_v8, %v399_v4  ;;  %v427_v19 = vmul.f32 (!%p1091_p13), %v1099_v6, %v1097_v10  ;;  %v1110_v20 = vld [vmem:[%s1938_s11 + $0x18] ss:$0 sm:$0xff] (!%p1091_p13)  ;;  %v1108_v22 = vld [vmem:[%s1938_s11 + $0x1c] sm:$0xf] (!%p1091_p13)  ;;  %v410_v23 = vsub.f32 (!%p1091_p13), %v407_v12, %v409_v7 }
  0xc3   : > { %v1111_v21 = vld [vmem:[%s1945_s24 + $0x18] ss:$0 sm:$0xff] (!%p1091_p13)  ;;  %v443_v25 = vmul.f32 (!%p1091_p13), %v1104_v11, %v1102_v15  ;;  %v449_v26 = vmul.f32 (!%p1091_p13), %v1105_v14, %v1103_v16  ;;  %v1109_v27 = vld [vmem:[%s1945_s24 + $0x1c] sm:$0xf] (!%p1091_p13)  ;;  %v465_v28 = vmul.f32 (!%p1091_p13), %v1110_v20, %v1108_v22  ;;  %v1112_v29 = vld [vmem:[%s1938_s11 + $0x1] ss:$0 sm:$0xff] (!%p1091_p13)  ;;  %v451_v33 = vmul.f32 (!%p1091_p13), %v1104_v11, %v1103_v16 }
  0xc4   : > { %v1113_v30 = vld [vmem:[%s1945_s24 + $0x1] ss:$0 sm:$0xff] (!%p1091_p13)  ;;  %v422_v31 = vadd.f32 (!%p1091_p13), %v421_v13, %v406_v18  ;;  %v430_v32 = vadd.f32 (!%p1091_p13), %v429_v17, %v410_v23  ;;  %v453_v34 = vmul.f32 (!%p1091_p13), %v1105_v14, %v1102_v15  ;;  %v483_v35 = vld [vmem:[%s1938_s11 + $0x4] sm:$0xf] (!%p1091_p13)  ;;  %v1118_v37 = vld [vmem:[%s1938_s11 + $0x9] ss:$0 sm:$0xff] (!%p1091_p13)  ;;  %v475_v47 = vmul.f32 (!%p1091_p13), %v1111_v21, %v1108_v22 }
  0xc5   : > { %v484_v36 = vld [vmem:[%s1945_s24 + $0x4] sm:$0xf] (!%p1091_p13)  ;;  %v489_v38 = vmul.f32 (!%p1091_p13), %v1112_v29, %v483_v35  ;;  %v1119_v40 = vld [vmem:[%s1945_s24 + $0x9] ss:$0 sm:$0xff] (!%p1091_p13)  ;;  %v1116_v41 = vld [vmem:[%s1938_s11 + $0xc] sm:$0xf] (!%p1091_p13)  ;;  %v499_v44 = vmul.f32 (!%p1091_p13), %v1113_v30, %v483_v35  ;;  %v473_v59 = vmul.f32 (!%p1091_p13), %v1110_v20, %v1109_v27  ;;  %v471_v0 = vmul.f32 (!%p1091_p13), %v1111_v21, %v1109_v27 }
  0xc6   : > { %v495_v39 = vmul.f32 %v1113_v30, %v484_v36  ;;  %v1117_v42 = vld [vmem:[%s1945_s24 + $0xc] sm:$0xf]  ;;  %v497_v43 = vmul.f32 %v1112_v29, %v484_v36  ;;  %v428_v45 = vadd.f32 %v427_v19, %v422_v31  ;;  %v432_v46 = vsub.f32 %v430_v32, %v431_v24  ;;  %v1124_v49 = vld [vmem:[%s1938_s11 + $0x11] ss:$0 sm:$0xff]  ;;  %v1122_v50 = vld [vmem:[%s1938_s11 + $0x14] sm:$0xf] }
  0xc7   : > { %v509_v48 = vmul.f32 %v1118_v37, %v1116_v41  ;;  %v515_v52 = vmul.f32 %v1119_v40, %v1117_v42  ;;  %v1125_v53 = vld [vmem:[%s1945_s24 + $0x11] ss:$0 sm:$0xff]  ;;  %v1123_v54 = vld [vmem:[%s1945_s24 + $0x14] sm:$0xf]  ;;  %v517_v56 = vmul.f32 %v1118_v37, %v1117_v42  ;;  %v1130_v60 = vld [vmem:[%s1938_s11 + $0x19] ss:$0 sm:$0xff]  ;;  %v519_v62 = vmul.f32 %v1119_v40, %v1116_v41 }
  0xc8   : > { %v496_v51 = vadd.f32 %v495_v39, %v489_v38  ;;  %v500_v55 = vsub.f32 %v497_v43, %v499_v44  ;;  %v444_v57 = vadd.f32 %v443_v25, %v428_v45  ;;  %v452_v58 = vadd.f32 %v451_v33, %v432_v46  ;;  %v1128_v61 = vld [vmem:[%s1938_s11 + $0x1c] sm:$0xf]  ;;  %v1132_v63 = vld [vmem:[%s1938_s11 + $0x2] ss:$0 sm:$0xff]  ;;  %v569_v5 = vld [vmem:[%s1938_s11 + $0x4] sm:$0xf] }
  0xc9   : > { %v529_v2 = vmul.f32 %v1124_v49, %v1122_v50  ;;  %v1133_v4 = vld [vmem:[%s1945_s24 + $0x2] ss:$0 sm:$0xff]  ;;  %v570_v6 = vld [vmem:[%s1945_s24 + $0x4] sm:$0xf]  ;;  %v535_v9 = vmul.f32 %v1125_v53, %v1123_v54  ;;  %v1129_v10 = vld [vmem:[%s1945_s24 + $0x1c] sm:$0xf]  ;;  %v537_v11 = vmul.f32 %v1124_v49, %v1123_v54  ;;  %v549_v15 = vmul.f32 %v1130_v60, %v1128_v61 }
  0xca   : > { %v510_v1 = vadd.f32 %v509_v48, %v496_v51  ;;  %v518_v3 = vadd.f32 %v517_v56, %v500_v55  ;;  %v450_v7 = vadd.f32 %v449_v26, %v444_v57  ;;  %v454_v8 = vsub.f32 %v452_v58, %v453_v34  ;;  %v1138_v12 = vld [vmem:[%s1938_s11 + $0xa] ss:$0 sm:$0xff]  ;;  %v1136_v13 = vld [vmem:[%s1938_s11 + $0xc] sm:$0xf]  ;;  %v1131_v21 = vld [vmem:[%s1945_s24 + $0x19] ss:$0 sm:$0xff] }
  0xcb   : > { %v539_v17 = vmul.f32 %v1125_v53, %v1122_v50  ;;  %v1139_v18 = vld [vmem:[%s1945_s24 + $0xa] ss:$0 sm:$0xff]  ;;  %v575_v22 = vmul.f32 %v1132_v63, %v569_v5  ;;  %v581_v23 = vmul.f32 %v1133_v4, %v570_v6  ;;  %v557_v26 = vmul.f32 %v1130_v60, %v1129_v10  ;;  %v1137_v27 = vld [vmem:[%s1945_s24 + $0xc] sm:$0xf]  ;;  %v1144_v30 = vld [vmem:[%s1938_s11 + $0x12] ss:$0 sm:$0xff] }
  0xcc   : > { %v516_v14 = vadd.f32 %v515_v52, %v510_v1  ;;  %v520_v16 = vsub.f32 %v518_v3, %v519_v62  ;;  %v466_v19 = vadd.f32 %v465_v28, %v450_v7  ;;  %v474_v20 = vadd.f32 %v473_v59, %v454_v8  ;;  %v1142_v31 = vld [vmem:[%s1938_s11 + $0x14] sm:$0xf]  ;;  %v1145_v39 = vld [vmem:[%s1945_s24 + $0x12] ss:$0 sm:$0xff]  ;;  %v1150_v45 = vld [vmem:[%s1938_s11 + $0x1a] ss:$0 sm:$0xff] }
  0xcd   : > { %v595_v29 = vmul.f32 %v1138_v12, %v1136_v13  ;;  %v582_v34 = vadd.f32 %v581_v23, %v575_v22  ;;  %v601_v35 = vmul.f32 %v1139_v18, %v1137_v27  ;;  %v555_v36 = vmul.f32 %v1131_v21, %v1129_v10  ;;  %v1143_v43 = vld [vmem:[%s1945_s24 + $0x14] sm:$0xf]  ;;  %v1148_v48 = vld [vmem:[%s1938_s11 + $0x1c] sm:$0xf]  ;;  %v1152_v51 = vld [vmem:[%s1938_s11 + $0x3] ss:$0 sm:$0xff] }
  0xce   : > { %v530_v24 = vadd.f32 %v529_v2, %v516_v14  ;;  %v538_v25 = vadd.f32 %v537_v11, %v520_v16  ;;  %v472_v32 = vadd.f32 %v471_v0, %v466_v19  ;;  %v476_v33 = vsub.f32 %v474_v20, %v475_v47  ;;  %v655_v52 = vld [vmem:[%s1938_s11 + $0x4] sm:$0xf]  ;;  %v1153_v56 = vld [vmem:[%s1945_s24 + $0x3] ss:$0 sm:$0xff]  ;;  %v1151_v60 = vld [vmem:[%s1945_s24 + $0x1a] ss:$0 sm:$0xff] }
  0xcf   : > { %v559_v38 = vmul.f32 %v1131_v21, %v1128_v61  ;;  %v596_v42 = vadd.f32 %v595_v29, %v582_v34  ;;  %v615_v44 = vmul.f32 %v1144_v30, %v1142_v31  ;;  %v583_v49 = vmul.f32 %v1132_v63, %v570_v6  ;;  %v656_v57 = vld [vmem:[%s1945_s24 + $0x4] sm:$0xf]  ;;  %v1158_v63 = vld [vmem:[%s1938_s11 + $0xb] ss:$0 sm:$0xff]  ;;  %v1156_v0 = vld [vmem:[%s1938_s11 + $0xc] sm:$0xf] }
  0xd0   : > { %v536_v28 = vadd.f32 %v535_v9, %v530_v24  ;;  %v540_v37 = vsub.f32 %v538_v25, %v539_v17  ;;  %v477_v40 = vmul.f32 2.0, %v472_v32  ;;  %v479_v41 = vmul.f32 2.0, %v476_v33  ;;  %v1149_v8 = vld [vmem:[%s1945_s24 + $0x1c] sm:$0xf]  ;;  %v1157_v14 = vld [vmem:[%s1945_s24 + $0xc] sm:$0xf] }
  0xd1   : > { %v585_v50 = vmul.f32 %v1133_v4, %v569_v5  ;;  %v602_v53 = vadd.f32 %v601_v35, %v596_v42  ;;  %v621_v54 = vmul.f32 %v1145_v39, %v1143_v43  ;;  %v603_v55 = vmul.f32 %v1138_v12, %v1137_v27  ;;  %v1159_v5 = vld [vmem:[%s1945_s24 + $0xb] ss:$0 sm:$0xff]  ;;  %v1162_v16 = vld [vmem:[%s1938_s11 + $0x14] sm:$0xf]  ;;  %v1165_v23 = vld [vmem:[%s1945_s24 + $0x13] ss:$0 sm:$0xff] }
  0xd2   : > { %v550_v46 = vadd.f32 %v549_v15, %v536_v28  ;;  %v558_v47 = vadd.f32 %v557_v26, %v540_v37  ;;  %478 = vst [vmem:[#allocation2] sm:$0xf] %v477_v40  ;;  %480 = vst [vmem:[#allocation3] sm:$0xf] %v479_v41  ;;  %v605_v62 = vmul.f32 %v1139_v18, %v1136_v13  ;;  %v1164_v13 = vld [vmem:[%s1938_s11 + $0x13] ss:$0 sm:$0xff] }
  0xd3   : > { %v586_v61 = vsub.f32 %v583_v49, %v585_v50  ;;  %v616_v1 = vadd.f32 %v615_v44, %v602_v53  ;;  %v635_v2 = vmul.f32 %v1150_v45, %v1148_v48  ;;  %v623_v3 = vmul.f32 %v1144_v30, %v1143_v43  ;;  %v1163_v29 = vld [vmem:[%s1945_s24 + $0x14] sm:$0xf]  ;;  %v1170_v34 = vld [vmem:[%s1938_s11 + $0x1b] ss:$0 sm:$0xff]  ;;  %v1168_v35 = vld [vmem:[%s1938_s11 + $0x1c] sm:$0xf] }
  0xd4   : > { %v556_v58 = vadd.f32 %v555_v36, %v550_v46  ;;  %v560_v59 = vsub.f32 %v558_v47, %v559_v38  ;;  %v661_v4 = vmul.f32 %v1152_v51, %v655_v52  ;;  %v667_v10 = vmul.f32 %v1153_v56, %v656_v57  ;;  %v1171_v41 = vld [vmem:[%s1945_s24 + $0x1b] ss:$0 sm:$0xff]  ;;  %v1169_v46 = vld [vmem:[%s1945_s24 + $0x1c] sm:$0xf] }
  0xd5   : > { %v604_v9 = vadd.f32 %v603_v55, %v586_v61  ;;  %v622_v11 = vadd.f32 %v621_v54, %v616_v1  ;;  %v641_v12 = vmul.f32 %v1151_v60, %v1149_v8  ;;  %v681_v15 = vmul.f32 %v1158_v63, %v1156_v0 }
  0xd6   : > { %v561_v6 = vmul.f32 2.0, %v556_v58  ;;  %v564_v7 = vmul.f32 2.0, %v560_v59  ;;  %v625_v18 = vmul.f32 %v1145_v39, %v1142_v31  ;;  %v668_v19 = vadd.f32 %v667_v10, %v661_v4 }
  0xd7   : > { %v606_v17 = vsub.f32 %v604_v9, %v605_v62  ;;  %v687_v20 = vmul.f32 %v1159_v5, %v1157_v14  ;;  %v636_v21 = vadd.f32 %v635_v2, %v622_v11  ;;  %v643_v22 = vmul.f32 %v1150_v45, %v1149_v8 }
  0xd8   : > { %563 = vst [vmem:[#allocation2 + $0x4] sm:$0xf] %v561_v6  ;;  %566 = vst [vmem:[#allocation3 + $0x4] sm:$0xf] %v564_v7  ;;  %v669_v24 = vmul.f32 %v1152_v51, %v656_v57  ;;  %v671_v25 = vmul.f32 %v1153_v56, %v655_v52  ;;  %v682_v27 = vadd.f32 %v681_v15, %v668_v19 }
  0xd9   : > { %v624_v26 = vadd.f32 %v623_v3, %v606_v17  ;;  %v701_v30 = vmul.f32 %v1164_v13, %v1162_v16  ;;  %v689_v32 = vmul.f32 %v1158_v63, %v1157_v14  ;;  %v642_v33 = vadd.f32 %v641_v12, %v636_v21 }
  0xda   : > { %v672_v28 = vsub.f32 %v669_v24, %v671_v25  ;;  %v691_v36 = vmul.f32 %v1159_v5, %v1156_v0  ;;  %v645_v37 = vmul.f32 %v1151_v60, %v1148_v48  ;;  %v688_v38 = vadd.f32 %v687_v20, %v682_v27 }
  0xdb   : > { %v626_v31 = vsub.f32 %v624_v26, %v625_v18  ;;  %v707_v39 = vmul.f32 %v1165_v23, %v1163_v29  ;;  %v647_v40 = vmul.f32 2.0, %v642_v33  ;;  %v709_v43 = vmul.f32 %v1164_v13, %v1163_v29 }
  0xdc   : > { %v690_v42 = vadd.f32 %v689_v32, %v672_v28  ;;  %v702_v45 = vadd.f32 %v701_v30, %v688_v38  ;;  %v721_v47 = vmul.f32 %v1170_v34, %v1168_v35  ;;  %v711_v50 = vmul.f32 %v1165_v23, %v1162_v16 }
  0xdd   : > { %v644_v44 = vadd.f32 %v643_v22, %v626_v31  ;;  %649 = vst [vmem:[#allocation2 + $0x8] sm:$0xf] %v647_v40  ;;  %v727_v53 = vmul.f32 %v1171_v41, %v1169_v46  ;;  %v729_v55 = vmul.f32 %v1170_v34, %v1169_v46  ;;  %v731_v58 = vmul.f32 %v1171_v41, %v1168_v35 }
  0xde   : > { %v692_v49 = vsub.f32 %v690_v42, %v691_v36  ;;  %v708_v52 = vadd.f32 %v707_v39, %v702_v45 }
  0xdf   : > { %v646_v51 = vsub.f32 %v644_v44, %v645_v37 }
  0xe0   : > { %v710_v54 = vadd.f32 %v709_v43, %v692_v49  ;;  %v722_v48 = vadd.f32 %v721_v47, %v708_v52 }
  0xe1   : > { %v650_v56 = vmul.f32 2.0, %v646_v51 }
  0xe2   : > { %v712_v57 = vsub.f32 %v710_v54, %v711_v50  ;;  %v728_v59 = vadd.f32 %v727_v53, %v722_v48 }
  0xe3   : > { %652 = vst [vmem:[#allocation3 + $0x8] sm:$0xf] %v650_v56 }
  0xe4   : > { %v730_v60 = vadd.f32 %v729_v55, %v712_v57  ;;  %v733_v61 = vmul.f32 2.0, %v728_v59 }
  0xe6   : > { %v732_v62 = vsub.f32 %v730_v60, %v731_v58  ;;  %735 = vst [vmem:[#allocation2 + $0xc] sm:$0xf] %v733_v61 }
  0xe8   : > { %v736_v63 = vmul.f32 2.0, %v732_v62 }
  0xea   : > { %738 = vst [vmem:[#allocation3 + $0xc] sm:$0xf] %v736_v63 }
  0xeb PF: > { %v739_v0 = vld [vmem:[%s331_s25] sm:$0xf]  ;;  %v740_v1 = vld [vmem:[%s340_s1] sm:$0xf]  ;;  %v742_v3 = vld [vmem:[#allocation3] sm:$0xf] }
  0xec   : > { %v741_v2 = vld [vmem:[#allocation2] sm:$0xf]  ;;  %v765_v5 = vld [vmem:[#allocation2 + $0x4] sm:$0xf]  ;;  %v744_v7 = vmul.f32 %v742_v3, %v740_v1  ;;  %v767_v8 = vld [vmem:[#allocation3 + $0x4] sm:$0xf]  ;;  %v755_v12 = vmul.f32 %v742_v3, %v739_v0 }
  0xed   : > { %v743_v4 = vmul.f32 %v741_v2, %v739_v0  ;;  %v754_v6 = vmul.f32 %v741_v2, %v740_v1  ;;  %v768_v9 = vmul.f32 %v765_v5, %v739_v0  ;;  %v789_v10 = vld [vmem:[#allocation2 + $0x8] sm:$0xf]  ;;  %v791_v11 = vld [vmem:[#allocation3 + $0x8] sm:$0xf]  ;;  %vm746_vm0 = vcmask 1043456   ;;  %s2223_s30 = sld [smem:[#allocation21_spill]] }
  0xee   : > { %v769_v14 = vmul.f32 %v767_v8, %v740_v1  ;;  %v792_v15 = vmul.f32 %v789_v10, %v739_v0  ;;  %v793_v13 = vmul.f32 %v791_v11, %v740_v1  ;;  %v813_v16 = vld [vmem:[#allocation2 + $0xc] sm:$0xf]  ;;  %v778_v21 = vmul.f32 %v765_v5, %v740_v1  ;;  %s2224_s21 = sld [smem:[#allocation22_spill]]  ;;  %s868_s11 = sshll.u32 %s379_s15, 4  ;;  %s2063_s11 = int_to_ptr.vmem [resolvable:$true] %s868_s11 }
  0xef   : > { %v745_v18 = vsub.f32 %v743_v4, %v744_v7  ;;  %v816_v19 = vmul.f32 %v813_v16, %v739_v0  ;;  %v756_v24 = vadd.f32 %v755_v12, %v754_v6  ;;  %v779_v25 = vmul.f32 %v767_v8, %v739_v0  ;;  %s2225_s6 = sld [smem:[#allocation26_spill]]  ;;  %s2226_s8 = sld [smem:[#allocation29_spill]] }
  0xf0   : > { %v770_v22 = vsub.f32 %v768_v9, %v769_v14  ;;  %v794_v23 = vsub.f32 %v792_v15, %v793_v13  ;;  %v802_v29 = vmul.f32 %v789_v10, %v740_v1  ;;  %v803_v30 = vmul.f32 %v791_v11, %v739_v0  ;;  %s848_s7 = scalar_lea.sflag [#allocation6], %s1952_s12  ;;  %s1425_s1 = scalar_lea.vmem %s2063_s11, 64 }
  0xf1   : > { %v815_v17 = vld [vmem:[#allocation3 + $0xc] sm:$0xf]  ;;  %v747_v26 = vsel %vm746_vm0, %v745_v18, 0.0  ;;  %v757_v35 = vsel %vm746_vm0, %v756_v24, 0.0  ;;  %vm836_vm1 = vcmask 1040384   ;;  %v780_v40 = vadd.f32 %v779_v25, %v778_v21  ;;  %p1426_p12 = scmp.ne.s32.totalorder %s2063_s11, %s1425_s1  ;;  %s1600_s13 = smov [#allocation12]  }
  0xf2   : > { %v817_v20 = vmul.f32 %v815_v17, %v740_v1  ;;  %v748_v32 = vrot.slane %v747_v26, 4  ;;  %v771_v33 = vsel %vm746_vm0, %v770_v22, 0.0  ;;  %v795_v34 = vsel %vm746_vm0, %v794_v23, 0.0 }
  0xf3   : > { %v772_v28 = vrot.slane %v771_v33, 4  ;;  %v796_v36 = vrot.slane %v795_v34, 4  ;;  %v758_v37 = vrot.slane %v757_v35, 4  ;;  %v804_v41 = vadd.f32 %v803_v30, %v802_v29  ;;  %s1174_s29 = sshll.u32 %s2223_s30, 1  ;;  %s1429_s30 = sshll.u32 %s1600_s13, 4  ;;  %s1430_s30 = int_to_ptr.vmem [resolvable:$false] %s1429_s30 }
  0xf4   : > { %v818_v27 = vsub.f32 %v816_v19, %v817_v20  ;;  %v749_v38 = vadd.f32 %v748_v32, %v747_v26  ;;  %v826_v45 = vmul.f32 %v813_v16, %v740_v1  ;;  %v781_v49 = vsel %vm746_vm0, %v780_v40, 0.0  ;;  %s2048_s9 = sadd.s32 %s2224_s21, %s1174_s29  ;;  %s1431_s21 = scalar_lea.vmem %s1430_s30, 128 }
  0xf5   : > { %v773_v42 = vadd.f32 %v772_v28, %v771_v33  ;;  %v797_v43 = vadd.f32 %v796_v36, %v795_v34  ;;  %v759_v44 = vadd.f32 %v758_v37, %v757_v35  ;;  %v805_v50 = vsel %vm746_vm0, %v804_v41, 0.0  ;;  %s1175_s4 = sshll.u32 %s2048_s9, 6  ;;  %p2227_p0 = scmp.ne.s32.totalorder %s2225_s6, 0 }
  0xf6   : > { %v819_v31 = vsel %vm746_vm0, %v818_v27, 0.0  ;;  %v750_v46 = vrot.slane %v749_v38, 2  ;;  %v782_v54 = vrot.slane %v781_v49, 4  ;;  %v806_v48 = vrot.slane %v805_v50, 4  ;;  %s2061_s25 = scalar_lea.hbm %s2226_s8, %s1175_s4  ;;  %p1432_p9 = scmp.lt.s32.totalorder %s2063_s11, %s1430_s30 }
  0xf7   : > { %v820_v39 = vrot.slane %v819_v31, 4  ;;  %v774_v51 = vrot.slane %v773_v42, 2  ;;  %v798_v52 = vrot.slane %v797_v43, 2  ;;  %v760_v53 = vrot.slane %v759_v44, 2  ;;  %p1427_p4 = pnand %p1426_p12, %p2227_p0  ;;  %p1433_p5 = scmp.lt.s32.totalorder %s1431_s21, %s1425_s1 }
  0xf8   : > { %v751_v55 = vadd.f32 %v750_v46, %v749_v38  ;;  %v827_v57 = vmul.f32 %v815_v17, %v739_v0  ;;  %v783_v61 = vadd.f32 %v782_v54, %v781_v49  ;;  %v807_v1 = vadd.f32 %v806_v48, %v805_v50 }
  0xf9   : > { %v821_v47 = vadd.f32 %v820_v39, %v819_v31  ;;  %v775_v58 = vadd.f32 %v774_v51, %v773_v42  ;;  %v799_v59 = vadd.f32 %v798_v52, %v797_v43  ;;  %v761_v60 = vadd.f32 %v760_v53, %v759_v44  ;;  %p1428_p8 = pneg %p1427_p4  ;;  %p1434_p10 = por %p1433_p5, %p1432_p9 }
  0xfa   : > { %v752_v62 = vrot.slane %v751_v55, 1  ;;  %v828_v2 = vadd.f32 %v827_v57, %v826_v45  ;;  %v784_v6 = vrot.slane %v783_v61, 2  ;;  %v808_v9 = vrot.slane %v807_v1, 2 }
  0xfb   : > { %v822_v56 = vrot.slane %v821_v47, 2  ;;  %v776_v3 = vrot.slane %v775_v58, 1  ;;  %v800_v4 = vrot.slane %v799_v59, 1  ;;  %v762_v5 = vrot.slane %v761_v60, 1  ;;  %p1435_p11 = pnand %p1434_p10, %p1428_p8 }
  0xfc   : > { %v753_v7 = vadd.f32 %v752_v62, %v751_v55  ;;  %v829_v0 = vsel %vm746_vm0, %v828_v2, 0.0  ;;  %vm838_vm2 = vcmask 1041408   ;;  %v785_v12 = vadd.f32 %v784_v6, %v783_v61 }
  0xfd   : > { %v823_v63 = vadd.f32 %v822_v56, %v821_v47  ;;  %v777_v10 = vadd.f32 %v776_v3, %v775_v58  ;;  %v801_v11 = vadd.f32 %v800_v4, %v799_v59  ;;  %vm840_vm3 = vcmask 1042432  }
  0xfe   : > { %v809_v15 = vadd.f32 %v808_v9, %v807_v1  ;;  %v830_v13 = vrot.slane %v829_v0, 4  ;;  %v786_v17 = vrot.slane %v785_v12, 1  ;;  %v763_v19 = vadd.f32 %v762_v5, %v761_v60 }
  0xff   : > { %v824_v8 = vrot.slane %v823_v63, 1  ;;  %v837_v16 = vsel %vm836_vm1, %v753_v7, %v777_v10 }
 0x100   : > { %v839_v18 = vsel %vm838_vm2, %v837_v16, %v801_v11  ;;  %v810_v20 = vrot.slane %v809_v15, 1  ;;  %v831_v21 = vadd.f32 %v830_v13, %v829_v0  ;;  %v787_v23 = vadd.f32 %v786_v17, %v785_v12 }
 0x101   : > { %v825_v14 = vadd.f32 %v824_v8, %v823_v63 }
 0x102   : > { %v832_v24 = vrot.slane %v831_v21, 2  ;;  %v811_v25 = vadd.f32 %v810_v20, %v809_v15 }
 0x103   : > { %v841_v22 = vsel %vm840_vm3, %v839_v18, %v825_v14 }
 0x104   : > { %842 = vst [vmem:[%s379_s15] sm:$0xf] %v841_v22 }
 0x105   : > { %1438 = shalt.err (!%p1435_p11)
}
 0x106   : > { %s1439_s15 = scalar_lea.hbm %s2061_s25, 64  ;;  %s1443_s24 = scalar_lea.hbm %s2226_s8, 256 }
 0x107   : > { %p1440_p6 = scmp.ne.s32.totalorder %s2061_s25, %s1439_s15  ;;  %p1444_p1 = scmp.lt.u32.totalorder %s2061_s25, %s2226_s8 }
 0x108   : > { %p1445_p2 = scmp.lt.u32.totalorder %s1443_s24, %s1439_s15  ;;  %p1447_p12 = scmp.lt.u32.totalorder %s1439_s15, %s2061_s25 }
 0x109   : > { %p1441_p7 = pnand %p1440_p6, %p2227_p0 }
 0x10a   : > { %p1446_p13 = por %p1445_p2, %p1444_p1 }
 0x10b   : > { %p1442_p3 = pneg %p1441_p7 }
 0x10c   : > { %p1448_p4 = por %p1447_p12, %p1446_p13 }
 0x10e   : > { %p1449_p8 = pnand %p1448_p4, %p1442_p3 }
 0x110   : > { %1452 = shalt.err (!%p1449_p8)
}
 0x111   : > { %1188 = dma.vmem_to_hbm [thread:$0]  (%p2227_p0), %s2063_s11, 64, %s2061_s25, %s848_s7   ;;  %v833_v26 = vadd.f32 %v832_v24, %v831_v21  ;;  %v843_v27 = vsel %vm836_vm1, %v763_v19, %v787_v23 }
 0x112   : > { %s883_s1 = sshll.u32 %s386_s14, 4  ;;  %v844_v30 = vsel %vm838_vm2, %v843_v27, %v811_v25  ;;  %s2228_s29 = sld [smem:[#allocation30_spill]]  ;;  %s2101_s1 = int_to_ptr.vmem [resolvable:$true] %s883_s1 }
 0x113   : > { %v834_v29 = vrot.slane %v833_v26, 1  ;;  %s853_s11 = scalar_lea.sflag [#allocation14], %s1952_s12  ;;  %s1453_s25 = scalar_lea.vmem %s2101_s1, 64 }
 0x114   : > { %p1454_p9 = scmp.ne.s32.totalorder %s2101_s1, %s1453_s25  ;;  %s1601_s9 = smov [#allocation13]  }
 0x115   : > { %v835_v32 = vadd.f32 %v834_v29, %v833_v26  ;;  %s1457_s7 = sshll.u32 %s1601_s9, 4  ;;  %s1458_s7 = int_to_ptr.vmem [resolvable:$false] %s1457_s7 }
 0x116   : > { %p1455_p5 = pnand %p1454_p9, %p2227_p0  ;;  %p1460_p11 = scmp.lt.s32.totalorder %s2101_s1, %s1458_s7 }
 0x117   : > { %v845_v33 = vsel %vm840_vm3, %v844_v30, %v835_v32 }
 0x118   : > { %s2099_s5 = scalar_lea.hbm %s2228_s29, %s1175_s4  ;;  %846 = vst [vmem:[%s386_s14] sm:$0xf] %v845_v33  ;;  %p1456_p10 = pneg %p1455_p5 }
 0x119   : > { %s1459_s4 = scalar_lea.vmem %s1458_s7, 128 }
 0x11a   : > { %p1461_p6 = scmp.lt.s32.totalorder %s1459_s4, %s1453_s25 }
 0x11c   : > { %p1462_p7 = por %p1461_p6, %p1460_p11 }
 0x11e   : > { %p1463_p3 = pnand %p1462_p7, %p1456_p10 }
 0x120   : > { %1466 = shalt.err (!%p1463_p3)
}
 0x121   : > { %s1467_s12 = scalar_lea.hbm %s2099_s5, 64  ;;  %s1471_s24 = scalar_lea.hbm %s2228_s29, 256 }
 0x122   : > { %p1468_p1 = scmp.ne.s32.totalorder %s2099_s5, %s1467_s12  ;;  %p1472_p12 = scmp.lt.u32.totalorder %s2099_s5, %s2228_s29 }
 0x123   : > { %p1473_p4 = scmp.lt.u32.totalorder %s1471_s24, %s1467_s12  ;;  %p1475_p9 = scmp.lt.u32.totalorder %s1467_s12, %s2099_s5 }
 0x124   : > { %p1469_p2 = pnand %p1468_p1, %p2227_p0 }
 0x125   : > { %p1474_p8 = por %p1473_p4, %p1472_p12 }
 0x126   : > { %p1470_p13 = pneg %p1469_p2 }
 0x127   : > { %p1476_p5 = por %p1475_p9, %p1474_p8 }
 0x129   : > { %p1477_p10 = pnand %p1476_p5, %p1470_p13 }
 0x12b   : > { %1480 = shalt.err (!%p1477_p10)
}
 0x12c   : > { %1189 = dma.vmem_to_hbm [thread:$0]  (%p2227_p0), %s2101_s1, 64, %s2099_s5, %s853_s11  }
 0x12d PF: > { %p1213_p11 = scmp.ge.s32.totalorder %s1591_s28, 2  ;;  %s895_s21 = sand.u32 1, %s1551_s18  }
 0x12e   : > { %p2229_p6 = scmp.ne.s32.totalorder %s2214_s17, 0  ;;  %s896_s15 = scalar_lea.sflag [#allocation6], %s895_s21 }
 0x130   : > { %p1206_p7 = pnand %p1213_p11, %p2229_p6 }
 0x132   : > { %1542 = dma.done.wait (!%p1206_p7), %s896_s15, 64  }
 0x133   : > { %1544 = vsyncadd (!%p1206_p7), %s896_s15, 4294967232  ;;  %s905_s25 = scalar_lea.sflag [#allocation14], %s895_s21 }
 0x134   : > { %1546 = dma.done.wait (!%p1206_p7), %s905_s25, 64  }
 0x135   : > { %1548 = vsyncadd (!%p1206_p7), %s905_s25, 4294967232  ;;  %s31_s28 = sadd.s32 1, %s1591_s28   ;;  %s2230_s6 = sld [smem:[#allocation23_spill]] }
 0x136   : > { %p28_p3 = scmp.ge.s32.totalorder %s31_s28, 6   ;;  %s2231_s17 = sld [smem:[#allocation24_spill]] }
 0x137   : > { %s2232_s18 = smov %s1555_s19  ;;  %s2233_s19 = smov %s1559_s20 }
 0x138   : > { %s2234_s20 = smov %s1851_s0  ;;  %s2235_s21 = smov %s1567_s22 }
 0x139   : > { %s2236_s22 = smov %s1571_s23  ;;  %s2237_s23 = smov %s1848_s16 }
 0x13a   : > { %s2238_s24 = smov %s1583_s26  ;;  %s2239_s25 = smov %s1587_s27 }
 0x13b   : > { %s2240_s26 = smov %s2230_s6  ;;  %30 = sbr.rel (!%p28_p3) target bundleno = 20 (0x14), region = 157 }
 0x13c   : > { %s2241_s27 = smov %s2231_s17 }
 0x142   :  { %910 = vsyncpa [#allocation5], 1 }
 0x143   :  { %912 = vsyncpa [#allocation5 + $0x1], 1 }
 0x144   :  { %913 = vsyncpa [#allocation8], 1 }
 0x145   :  { %915 = vsyncpa [#allocation8 + $0x1], 1 }
 0x146   :  { %916 = vsyncpa [#allocation11], 1 }
 0x147   :  { %918 = vsyncpa [#allocation11 + $0x1], 1 }
 0x148   :  { %919 = vsyncpa [#allocation6], 1 }
 0x149   :  { %921 = vsyncpa [#allocation6 + $0x1], 1 }
 0x14a   :  { %922 = vsyncpa [#allocation14], 1 }
 0x14b   :  { %924 = vsyncpa [#allocation14 + $0x1], 1 }

</bundles_post_ra>
